<compile_context>
chip_gen: v7x
topology: tpu7x:2x2x1
jax: 0.10.0
libtpu: 0.0.40
codegen_flags: <defaults>
</compile_context>

<pallas_src>
import functools

import jax
import jax.numpy as jnp
from jax.experimental import pallas as pl
from jax.experimental.pallas import tpu as pltpu


# ------------------------------ tiling knobs -------------------------------

_LANES = 512                 # lane-dense width (multiple of 128) -> unmasked vst
_TARGET_TILE_BYTES = 4 << 20  # ~4 MiB per operand per block
_VMEM_LIMIT_BYTES = 32 << 20  # raise v5e's 16 MiB scoped default; v6e/v7x default
_SMALL_BYTES = 256 << 10      # below this per operand, plain fused XLA wins


def _round_up(n, m):
    return ((n + m - 1) // m) * m


def _sublane_multiple(dtype):
    # Sub-32-bit dtypes pack along sublanes: min tile is (8,128) f32,
    # (16,128) bf16/f16, (32,128) int8/fp8.
    size = jnp.dtype(dtype).itemsize
    if size >= 4:
        return 8
    if size == 2:
        return 16
    return 32


def _is_elementwise(fn):
    if getattr(fn, "_pallas_elementwise", False):
        return True
    inner = getattr(fn, "func", None)   # functools.partial
    return bool(getattr(inner, "_pallas_elementwise", False))


def elementwise(fn):
    """Mark `fn` as a shape-agnostic elementwise map (safe for the Pallas path)."""
    fn._pallas_elementwise = True
    return fn


# ----------------------------- Pallas kernel ------------------------------

def _expression_kernel(x_ref, o_ref, *, expression_fn, compute_dtype):
    # Elementwise hot path: the user expression is traced directly into the
    # kernel body and executed over the VMEM-resident lane-dense tile
    # (VPU/EUP work; the kernel is HBM-bandwidth bound).
    x = x_ref[...]
    if compute_dtype is not None:
        x = x.astype(compute_dtype)          # f32 math for bf16/f16 log-like fns
    o_ref[...] = expression_fn(x).astype(o_ref.dtype)


def _apply_expression_pallas(expression_fn, x):
    """Run a whitelisted elementwise `expression_fn` over `x` via Pallas."""
    # Trace once to learn output shape/dtype; anything surprising -> fallback.
    try:
        out_aval = jax.eval_shape(
            expression_fn, jax.ShapeDtypeStruct(x.shape, x.dtype))
    except Exception:
        return expression_fn(x)
    if (not isinstance(out_aval, jax.ShapeDtypeStruct)
            or out_aval.shape != x.shape):
        return expression_fn(x)
    out_dtype = jnp.dtype(out_aval.dtype)
    if out_dtype == jnp.dtype(bool) or out_dtype.itemsize not in (1, 2, 4):
        return expression_fn(x)

    total = int(x.size)
    in_itemsize = jnp.dtype(x.dtype).itemsize
    out_itemsize = out_dtype.itemsize
    if total == 0:
        return expression_fn(x)

    # Small-input fast path: launch overhead beats any kernel win; let XLA
    # fuse the expression into neighboring ops (covers ShallowFBCSPNet maps).
    if max(total * in_itemsize, total * out_itemsize) <= _SMALL_BYTES:
        return expression_fn(x)

    lanes = _LANES
    if total % lanes != 0:
        # TODO(synk): handle the <512-element tail in-kernel (scalar-prefetched
        # length + masked store on the last step) instead of falling back.
        return expression_fn(x)

    rows = total // lanes
    sub = max(_sublane_multiple(x.dtype), _sublane_multiple(out_dtype))
    itemsize = max(in_itemsize, out_itemsize)
    max_tile_rows = max(
        sub, ((_TARGET_TILE_BYTES // (lanes * itemsize)) // sub) * sub)

    if rows <= max_tile_rows:
        if rows >= 4 * sub:
            # Split into >=2 "parallel" steps so v7x megacore uses both TCs.
            tile_rows = _round_up(pl.cdiv(rows, 2), sub)
        else:
            tile_rows = rows  # single full-array block (always legal)
    else:
        tile_rows = max_tile_rows
    grid_rows = pl.cdiv(rows, tile_rows)  # ragged last block handled by Pallas

    # f32 math for packed floats (matches PyTorch float32 safe_log numerics).
    compute_dtype = (jnp.float32
                     if jnp.issubdtype(x.dtype, jnp.floating) and in_itemsize < 4
                     else None)

    cost = pl.CostEstimate(
        flops=total,
        transcendentals=total,  # rough upper bound (log-containing expressions)
        bytes_accessed=total * (in_itemsize + out_itemsize))

    x2d = x.reshape(rows, lanes)  # free: pure lane-dense re-view, no copy
    out2d = pl.pallas_call(
        functools.partial(_expression_kernel,
                          expression_fn=expression_fn,
                          compute_dtype=compute_dtype),
        out_shape=jax.ShapeDtypeStruct((rows, lanes), out_dtype),
        grid=(grid_rows,),
        in_specs=[pl.BlockSpec((tile_rows, lanes), lambda i: (i, 0))],
        out_specs=pl.BlockSpec((tile_rows, lanes), lambda i: (i, 0)),
        compiler_params=pltpu.CompilerParams(
            # Pure elementwise map: row-tiles are independent -> shardable
            # across TensorCores (v7x megacore).
            dimension_semantics=("parallel",),
            vmem_limit_bytes=_VMEM_LIMIT_BYTES,
        ),
        cost_estimate=cost,
    )(x2d)
    return out2d.reshape(x.shape)


# --------------------------- Expression module ----------------------------

class Expression:
    """JAX/Pallas port of the PyTorch `Expression` module.

    Parameters
    ----------
    expression_fn : callable
        Traceable expression applied to the input(s).  Elementwise-marked
        expressions (see `elementwise`) run inside a Pallas TPU kernel when
        the input is large enough; everything else runs as plain JAX with the
        original semantics.
    """

    def __init__(self, expression_fn):
        self.expression_fn = expression_fn

    def __call__(self, *x):
        # Single-tensor, whitelisted elementwise case -> Pallas hot path.
        if len(x) == 1 and _is_elementwise(self.expression_fn):
            return _apply_expression_pallas(self.expression_fn, x[0])
        # TODO(synk): multi-argument / non-elementwise expressions fall back to
        # plain JAX (the original module accepts *x of arbitrary semantics).
        return self.expression_fn(*x)

    def __repr__(self):
        if hasattr(self.expression_fn, "func") and hasattr(self.expression_fn, "keywords"):
            expression_str = "{:s} {:s}".format(
                self.expression_fn.func.__name__, str(self.expression_fn.keywords))
        elif hasattr(self.expression_fn, "__name__"):
            expression_str = self.expression_fn.__name__
        else:
            expression_str = repr(self.expression_fn)
        return self.__class__.__name__ + "(expression=%s) " % expression_str


def fuse_expressions(*modules):
    """Compose chained elementwise Expression modules into ONE kernel.

    The composed expression is traced into a single pallas_call, halving HBM
    traffic vs. running the (memory-bound) modules back to back.
    """
    fns = [m.expression_fn if isinstance(m, Expression) else m for m in modules]

    def _name(f):
        return getattr(f, "__name__",
                       getattr(getattr(f, "func", None), "__name__", "fn"))

    def fused(x):
        for fn in fns:
            x = fn(x)
        return x

    fused.__name__ = "fused(" + ",".join(_name(f) for f in fns) + ")"
    if all(_is_elementwise(f) for f in fns):
        fused._pallas_elementwise = True
    return Expression(fused)


# Canonical expressions used with this module (braindecode ShallowFBCSPNet).
@elementwise
def square(x):
    return x * x


@elementwise
def safe_log(x, eps=1e-6):
    return jnp.log(jnp.maximum(x, eps))


# --------------------------------- main -----------------------------------

if __name__ == "__main__":
    key = jax.random.PRNGKey(0)
    k1, k2 = jax.random.split(key)

    square_mod = Expression(square)
    log_mod = Expression(functools.partial(safe_log, eps=1e-6))
    fused_mod = fuse_expressions(square_mod, log_mod)

    # 1) Canonical small ShallowFBCSPNet-style feature map (NCHW).
    #    Small-input fast path: plain fused XLA, no Pallas launch.
    x = jax.random.normal(k1, (2, 4, 16, 16), dtype=jnp.float32)
    ref = jnp.log(jnp.maximum(x * x, 1e-6))
    z_chained = jax.block_until_ready(log_mod(square_mod(x)))
    z_fused = jax.block_until_ready(fused_mod(x))
    assert z_chained.shape == x.shape and z_chained.dtype == x.dtype
    assert z_fused.shape == x.shape and z_fused.dtype == x.dtype
    assert jnp.allclose(z_chained, ref, atol=1e-5, rtol=1e-5), "small chained mismatch"
    assert jnp.allclose(z_fused, ref, atol=1e-5, rtol=1e-5), "small fused mismatch"

    # 2) Larger feature map that exercises the Pallas hot path (grid=(2,),
    #    lane-dense 512-wide blocks, zero-copy reshape, chained vs fused).
    xl = jax.random.normal(k2, (2, 40, 128, 64), dtype=jnp.float32)
    ref_l = jnp.log(jnp.maximum(xl * xl, 1e-6))
    zl_chained = jax.block_until_ready(log_mod(square_mod(xl)))
    zl_fused = jax.block_until_ready(fused_mod(xl))
    assert zl_chained.shape == xl.shape and zl_chained.dtype == xl.dtype
    assert zl_fused.shape == xl.shape and zl_fused.dtype == xl.dtype
    assert jnp.allclose(zl_chained, ref_l, atol=1e-5, rtol=1e-5), "large chained mismatch"
    assert jnp.allclose(zl_fused, ref_l, atol=1e-5, rtol=1e-5), "large fused mismatch"

    # 3) bf16 input: exercises the (16,128) sublane rounding and the in-kernel
    #    f32 upcast for log numerics.
    xb = xl.astype(jnp.bfloat16)
    ref_b = jnp.log(jnp.maximum(jnp.square(xb.astype(jnp.float32)), 1e-6)
                    ).astype(jnp.bfloat16)
    zb_fused = jax.block_until_ready(fused_mod(xb))
    assert zb_fused.shape == xb.shape and zb_fused.dtype == jnp.bfloat16
    assert jnp.allclose(zb_fused.astype(jnp.float32), ref_b.astype(jnp.float32),
                        atol=2e-2, rtol=2e-2), "bf16 fused mismatch"

    print("KERNEL_OK")
</pallas_src>

<mosaic_0001>
module attributes {stable_mosaic.version = 11 : i64} {
  func.func @_expression_kernel(%arg0: i32, %arg1: memref<640x512xf32, #tpu.memory_space<vmem>>, %arg2: memref<640x512xf32, #tpu.memory_space<vmem>>) attributes {dimension_semantics = [#tpu.dimension_semantics<parallel>], iteration_bounds = array<i64: 2>, scalar_prefetch = 0 : i64, scratch_operands = 0 : i64, tpu.core_type = #tpu.core_type<tc>, window_params = [{transform_indices = @transform_0, window_bounds = array<i64: 640, 512>}, {transform_indices = @transform_1, window_bounds = array<i64: 640, 512>}]} {
    %c0 = arith.constant 0 : index
    %c0_0 = arith.constant 0 : index
    %0 = vector.load %arg1[%c0, %c0_0] : memref<640x512xf32, #tpu.memory_space<vmem>>, vector<640x512xf32>
    %1 = arith.mulf %0, %0 : vector<640x512xf32>
    %c0_1 = arith.constant 0 : index
    %c0_2 = arith.constant 0 : index
    %2 = vector.load %arg2[%c0_1, %c0_2] : memref<640x512xf32, #tpu.memory_space<vmem>>, vector<640x512xf32>
    tpu.vector_store %arg2[%c0_1, %c0_2], %1 {strides = array<i32>} : memref<640x512xf32, #tpu.memory_space<vmem>>, vector<640x512xf32>,
    return
  }
  func.func @transform_0(%arg0: i32) -> (i32, i32) {
    %c0_i32 = arith.constant 0 : i32
    %c0_i32_0 = arith.constant 0 : i32
    return %arg0, %c0_i32 : i32, i32
  }
  func.func @transform_1(%arg0: i32) -> (i32, i32) {
    %c0_i32 = arith.constant 0 : i32
    %c0_i32_0 = arith.constant 0 : i32
    return %arg0, %c0_i32 : i32, i32
  }
}

</mosaic_0001>

<bundles_post_ra>
// kernel: tpu_custom_call.1
= control target key start
LH: loop header
LB: loop body
LE: loop exit
PB: predicated region body
PF: predicated region fallthrough
CT: control target
= control target key end

     0   :  { %6 = vsyncpa [#allocation3], 0  ;;  %s2171_s0 = inlined_call_operand.hbm [shape: f32[1280,512], index: 0, kind: input, shape index: {}]   ;;  %s2172_s1 = inlined_call_operand.hbm [shape: f32[1280,512], index: 1, kind: output, shape index: {}]  }
   0x1   :  { %8 = vsyncpa [#allocation3 + $0x1], 0 }
   0x2   :  { %9 = vsyncpa [#allocation4], 0 }
   0x3   :  { %11 = vsyncpa [#allocation4 + $0x1], 0  ;;  %s1368_s6 = smov 0   ;;  %s1370_s7 = smov 0  }
   0x4   :  { %s1372_s8 = smov 0   ;;  %s1374_s9 = smov 0  }
   0x5 LB: > { %s1389_s10 = sadd.s32 4294967295, %s1350_s9   ;;  %s1186_s11 = sadd.s32 4294967294, %s1350_s9   ;;  %s1350_s9 = sphi %s1374_s9, %s2184_s9   ;;  %s1346_s8 = sphi %s1372_s8, %s2183_s8   ;;  %s1342_s7 = sphi %s1370_s7, %s2182_s7   ;;  %s1338_s6 = sphi %s1368_s6, %s2181_s6  }
   0x6   : > { %s1393_s12 = sadd.s32 1, %s1350_s9   ;;  %s24_s13 = sadd.s32 1, %s1346_s8 }
   0x7   : > { %s21_s14 = ssub.s32 %s1350_s9, %s1393_s12  ;;  %p31_p0 = scmp.ne.s32.totalorder %s1346_s8, %s1342_s7 }
   0x8   : > { %p22_p1 = scmp.eq.s32.totalorder %s21_s14, 0  ;;  %p32_p2 = scmp.eq.s32.totalorder %s1350_s9, 0 }
   0x9   : > { %p37_p3 = scmp.ne.s32.totalorder %s1342_s7, %s1338_s6  ;;  %p38_p4 = scmp.eq.s32.totalorder %s1389_s10, 0 }
   0xa   : > { %s1405_s15 = scalar_select %p22_p1, %s1346_s8, %s24_s13  }
   0xb   : > { %p33_p5 = por %p32_p2, %p31_p0  ;;  %p1407_p6 = por %p38_p4, %p37_p3 }
   0xc   : > { %p61_p7 = scmp.eq.s32.totalorder %s1389_s10, 1  ;;  %p67_p8 = scmp.eq.s32.totalorder %s1186_s11, 1 }
   0xd   : > { %p1216_p10 = scmp.lt.s32.totalorder %s1350_s9, 2  ;;  %s87_s19 = sand.u32 1, %s1346_s8  }
   0xe   : > { %p1414_p11 = por %p61_p7, %p31_p0  ;;  %p1418_p12 = por %p67_p8, %p37_p3 }
   0xf   : > { %s1200_s20 = smul.u32 40960, %s1350_s9  ;;  %p1429_p13 = pnand %p1216_p10, %p33_p5 }
  0x10   : > { %s2175_s17 = scalar_select %p1414_p11, 1, 0 }
  0x11   : > { %s2176_s18 = scalar_select %p1418_p12, 1, 0 }
  0x12   : > { %s1202_s21 = smul.u32 2560, %s87_s19  ;;  %s1427_s24 = scalar_lea.hbm %s2171_s0, %s1200_s20 }
  0x13   : > { %s1435_s28 = scalar_lea.sflag [#allocation3], %s87_s19  ;;  %s1254_s29 = scalar_lea.hbm %s1427_s24, 40960 }
  0x14   : > { %s91_s26 = scalar_lea.vmem [#allocation2], %s1202_s21  ;;  %p1255_p0 = scmp.ne.s32.totalorder %s1427_s24, %s1254_s29 }
  0x15   : > { %s99_s27 = sshll.u32 %s91_s26, 4  ;;  %p1256_p1 = pneg %p1429_p13  ;;  %s1433_s27 = int_to_ptr.vmem [resolvable:$true] %s99_s27 }
  0x16   : > { %s1259_s3 = scalar_lea.hbm %s2171_s0, 81920  ;;  %p1260_p4 = scmp.lt.u32.totalorder %s1427_s24, %s2171_s0 }
  0x17   : > { %p1257_p2 = pnand %p1256_p1, %p1255_p0  ;;  %p1261_p5 = scmp.lt.u32.totalorder %s1259_s3, %s1254_s29 }
  0x18   : > { %p1263_p8 = scmp.lt.u32.totalorder %s1254_s29, %s1427_s24 }
  0x19   : > { %p1258_p3 = pneg %p1257_p2  ;;  %p1262_p7 = por %p1261_p5, %p1260_p4 }
  0x1b   : > { %p1264_p10 = por %p1263_p8, %p1262_p7 }
  0x1d   : > { %p1265_p9 = pnand %p1264_p10, %p1258_p3 }
  0x1f   : > { %1268 = shalt.err (!%p1265_p9)
}
  0x20   : > { %s1269_s11 = scalar_lea.vmem %s1433_s27, 40960  ;;  %s1352_s13 = smov [#allocation2]  }
  0x21   : > { %p1270_p0 = scmp.ne.s32.totalorder %s1433_s27, %s1269_s11  ;;  %s1274_s14 = sshll.u32 %s1352_s13, 4  ;;  %s1275_s14 = int_to_ptr.vmem [resolvable:$false] %s1274_s14 }
  0x22   : > { %s1276_s19 = scalar_lea.vmem %s1275_s14, 81920  ;;  %p1277_p11 = scmp.lt.s32.totalorder %s1433_s27, %s1275_s14 }
  0x23   : > { %p1272_p2 = pnand %p1270_p0, %p1256_p1  ;;  %p1278_p4 = scmp.lt.s32.totalorder %s1276_s19, %s1269_s11 }
  0x25   : > { %p1273_p12 = pneg %p1272_p2  ;;  %p1279_p5 = por %p1278_p4, %p1277_p11 }
  0x27   : > { %p1280_p7 = pnand %p1279_p5, %p1273_p12 }
  0x29   : > { %1283 = shalt.err (!%p1280_p7)
}
  0x2a   : > { %s1353_s20 = smov 512   ;;  %s1354_s21 = smov 32  }
  0x2b   : > { %1211 = dma.hbm_to_vmem [thread:$0]  (!%p1429_p13), %s1427_s24, 40960, %s1433_s27, %s1435_s28, %s1353_s20, %s1353_s20, %s1354_s21  }
  0x2c   : > { %p1191_p9 = scmp.ge.s32.totalorder %s1350_s9, 1  ;;  %p107_p1 = scmp.lt.s32.totalorder %s1350_s9, 3 }
  0x2e   : > { %p108_p3 = pnand %p1191_p9, %p107_p1 }
  0x2f   : > { %s1466_s22 = sand.u32 (!%p108_p3), 1, %s1342_s7  }
  0x30   : > { %111 = sbr.rel (%p108_p3) target bundleno = 233 (0xe9), region = 24  ;;  %s114_s26 = scalar_lea.sflag (!%p108_p3), [#allocation3], %s1466_s22 }
  0x31   : > { %s1203_s23 = smul.u32 (!%p108_p3), 2560, %s1466_s22 }
  0x33   : > { %s1470_s29 = scalar_lea.vmem (!%p108_p3), [#allocation2], %s1203_s23 }
  0x37   : > { %1329 = dma.done.wait (%p1407_p6), %s114_s26, 40960  }
  0x38   : > { %1331 = vsyncadd (%p1407_p6), %s114_s26, 4294926336  ;;  %v138_v0 = vld [vmem:[%s1470_s29] sm:$0xff]  ;;  %v139_v1 = vld [vmem:[%s1470_s29 + $0x8] sm:$0xff]  ;;  %s1485_s16 = scalar_lea.vmem [#allocation5], %s1203_s23  ;;  %s1201_s24 = smul.u32 40960, %s1389_s10 }
  0x39   : > { %v140_v2 = vld [vmem:[%s1470_s29 + $0x10] sm:$0xff]  ;;  %v458_v3 = vmul.f32 %v138_v0, %v138_v0  ;;  %v459_v4 = vmul.f32 %v139_v1, %v139_v1  ;;  %v141_v6 = vld [vmem:[%s1470_s29 + $0x18] sm:$0xff]  ;;  %v142_v7 = vld [vmem:[%s1470_s29 + $0x20] sm:$0xff]  ;;  %s1113_s25 = sshll.u32 %s1485_s16, 4  ;;  %s1099_s2 = scalar_lea.sflag [#allocation4], %s1466_s22  ;;  %s2112_s25 = int_to_ptr.vmem [resolvable:$true] %s1113_s25 }
  0x3a   : > { %v460_v5 = vmul.f32 %v140_v2, %v140_v2  ;;  %v143_v8 = vld [vmem:[%s1470_s29 + $0x28] sm:$0xff]  ;;  %v461_v9 = vmul.f32 %v141_v6, %v141_v6  ;;  %v462_v10 = vmul.f32 %v142_v7, %v142_v7  ;;  %v144_v12 = vld [vmem:[%s1470_s29 + $0x30] sm:$0xff]  ;;  %v145_v13 = vld [vmem:[%s1470_s29 + $0x38] sm:$0xff]  ;;  %s2122_s30 = scalar_lea.hbm %s2172_s1, %s1201_s24  ;;  %s1284_s3 = scalar_lea.vmem %s2112_s25, 40960 }
  0x3b   : > { %v463_v11 = vmul.f32 %v143_v8, %v143_v8  ;;  %v146_v14 = vld [vmem:[%s1470_s29 + $0x40] sm:$0xff]  ;;  %778 = vst [vmem:[%s1485_s16] sm:$0xff] %v458_v3  ;;  %779 = vst [vmem:[%s1485_s16 + $0x8] sm:$0xff] %v459_v4  ;;  %v464_v15 = vmul.f32 %v144_v12, %v144_v12  ;;  %v465_v16 = vmul.f32 %v145_v13, %v145_v13  ;;  %v147_v18 = vld [vmem:[%s1470_s29 + $0x48] sm:$0xff]  ;;  %p1285_p6 = scmp.ne.s32.totalorder %s2112_s25, %s1284_s3  ;;  %p2178_p11 = scmp.ne.s32.totalorder %s2175_s17, 0 }
  0x3c   : > { %780 = vst [vmem:[%s1485_s16 + $0x10] sm:$0xff] %v460_v5  ;;  %v466_v17 = vmul.f32 %v146_v14, %v146_v14  ;;  %v148_v19 = vld [vmem:[%s1470_s29 + $0x50] sm:$0xff]  ;;  %v149_v20 = vld [vmem:[%s1470_s29 + $0x58] sm:$0xff]  ;;  %781 = vst [vmem:[%s1485_s16 + $0x18] sm:$0xff] %v461_v9  ;;  %v467_v21 = vmul.f32 %v147_v18, %v147_v18  ;;  %s1355_s4 = smov [#allocation5]  }
  0x3d   : > { %782 = vst [vmem:[%s1485_s16 + $0x20] sm:$0xff] %v462_v10  ;;  %783 = vst [vmem:[%s1485_s16 + $0x28] sm:$0xff] %v463_v11  ;;  %v468_v22 = vmul.f32 %v148_v19, %v148_v19  ;;  %v469_v23 = vmul.f32 %v149_v20, %v149_v20  ;;  %v150_v24 = vld [vmem:[%s1470_s29 + $0x60] sm:$0xff]  ;;  %v151_v25 = vld [vmem:[%s1470_s29 + $0x68] sm:$0xff]  ;;  %p1286_p12 = pnand %p1285_p6, %p2178_p11  ;;  %s1288_s5 = sshll.u32 %s1355_s4, 4  ;;  %s1289_s5 = int_to_ptr.vmem [resolvable:$false] %s1288_s5 }
  0x3e   : > { %v152_v26 = vld [vmem:[%s1470_s29 + $0x70] sm:$0xff]  ;;  %784 = vst [vmem:[%s1485_s16 + $0x30] sm:$0xff] %v464_v15  ;;  %785 = vst [vmem:[%s1485_s16 + $0x38] sm:$0xff] %v465_v16  ;;  %v470_v27 = vmul.f32 %v150_v24, %v150_v24  ;;  %v471_v28 = vmul.f32 %v151_v25, %v151_v25  ;;  %v153_v30 = vld [vmem:[%s1470_s29 + $0x78] sm:$0xff]  ;;  %s1290_s10 = scalar_lea.vmem %s1289_s5, 81920  ;;  %p1291_p8 = scmp.lt.s32.totalorder %s2112_s25, %s1289_s5 }
  0x3f   : > { %786 = vst [vmem:[%s1485_s16 + $0x40] sm:$0xff] %v466_v17  ;;  %v472_v29 = vmul.f32 %v152_v26, %v152_v26  ;;  %v154_v31 = vld [vmem:[%s1470_s29 + $0x80] sm:$0xff]  ;;  %v155_v32 = vld [vmem:[%s1470_s29 + $0x88] sm:$0xff]  ;;  %787 = vst [vmem:[%s1485_s16 + $0x48] sm:$0xff] %v467_v21  ;;  %v473_v33 = vmul.f32 %v153_v30, %v153_v30  ;;  %p1287_p13 = pneg %p1286_p12  ;;  %p1292_p10 = scmp.lt.s32.totalorder %s1290_s10, %s1284_s3 }
  0x40   : > { %788 = vst [vmem:[%s1485_s16 + $0x50] sm:$0xff] %v468_v22  ;;  %789 = vst [vmem:[%s1485_s16 + $0x58] sm:$0xff] %v469_v23  ;;  %v474_v34 = vmul.f32 %v154_v31, %v154_v31  ;;  %v475_v35 = vmul.f32 %v155_v32, %v155_v32  ;;  %v156_v36 = vld [vmem:[%s1470_s29 + $0x90] sm:$0xff]  ;;  %v157_v37 = vld [vmem:[%s1470_s29 + $0x98] sm:$0xff] }
  0x41   : > { %v158_v38 = vld [vmem:[%s1470_s29 + $0xa0] sm:$0xff]  ;;  %790 = vst [vmem:[%s1485_s16 + $0x60] sm:$0xff] %v470_v27  ;;  %791 = vst [vmem:[%s1485_s16 + $0x68] sm:$0xff] %v471_v28  ;;  %v476_v39 = vmul.f32 %v156_v36, %v156_v36  ;;  %v477_v40 = vmul.f32 %v157_v37, %v157_v37  ;;  %v159_v42 = vld [vmem:[%s1470_s29 + $0xa8] sm:$0xff]  ;;  %p1293_p0 = por %p1292_p10, %p1291_p8 }
  0x42   : > { %792 = vst [vmem:[%s1485_s16 + $0x70] sm:$0xff] %v472_v29  ;;  %v478_v41 = vmul.f32 %v158_v38, %v158_v38  ;;  %v160_v43 = vld [vmem:[%s1470_s29 + $0xb0] sm:$0xff]  ;;  %v161_v44 = vld [vmem:[%s1470_s29 + $0xb8] sm:$0xff]  ;;  %793 = vst [vmem:[%s1485_s16 + $0x78] sm:$0xff] %v473_v33  ;;  %v479_v45 = vmul.f32 %v159_v42, %v159_v42 }
  0x43   : > { %794 = vst [vmem:[%s1485_s16 + $0x80] sm:$0xff] %v474_v34  ;;  %795 = vst [vmem:[%s1485_s16 + $0x88] sm:$0xff] %v475_v35  ;;  %v480_v46 = vmul.f32 %v160_v43, %v160_v43  ;;  %v481_v47 = vmul.f32 %v161_v44, %v161_v44  ;;  %v162_v48 = vld [vmem:[%s1470_s29 + $0xc0] sm:$0xff]  ;;  %v163_v49 = vld [vmem:[%s1470_s29 + $0xc8] sm:$0xff]  ;;  %p1294_p2 = pnand %p1293_p0, %p1287_p13 }
  0x44   : > { %v164_v50 = vld [vmem:[%s1470_s29 + $0xd0] sm:$0xff]  ;;  %796 = vst [vmem:[%s1485_s16 + $0x90] sm:$0xff] %v476_v39  ;;  %797 = vst [vmem:[%s1485_s16 + $0x98] sm:$0xff] %v477_v40  ;;  %v482_v51 = vmul.f32 %v162_v48, %v162_v48  ;;  %v483_v52 = vmul.f32 %v163_v49, %v163_v49  ;;  %v165_v54 = vld [vmem:[%s1470_s29 + $0xd8] sm:$0xff] }
  0x45   : > { %798 = vst [vmem:[%s1485_s16 + $0xa0] sm:$0xff] %v478_v41  ;;  %v484_v53 = vmul.f32 %v164_v50, %v164_v50  ;;  %v166_v55 = vld [vmem:[%s1470_s29 + $0xe0] sm:$0xff]  ;;  %v167_v56 = vld [vmem:[%s1470_s29 + $0xe8] sm:$0xff]  ;;  %799 = vst [vmem:[%s1485_s16 + $0xa8] sm:$0xff] %v479_v45  ;;  %v485_v57 = vmul.f32 %v165_v54, %v165_v54 }
  0x46   : > { %800 = vst [vmem:[%s1485_s16 + $0xb0] sm:$0xff] %v480_v46  ;;  %801 = vst [vmem:[%s1485_s16 + $0xb8] sm:$0xff] %v481_v47  ;;  %v486_v58 = vmul.f32 %v166_v55, %v166_v55  ;;  %v487_v59 = vmul.f32 %v167_v56, %v167_v56  ;;  %v168_v60 = vld [vmem:[%s1470_s29 + $0xf0] sm:$0xff]  ;;  %v169_v61 = vld [vmem:[%s1470_s29 + $0xf8] sm:$0xff] }
  0x47   : > { %v170_v62 = vld [vmem:[%s1470_s29 + $0x100] sm:$0xff]  ;;  %802 = vst [vmem:[%s1485_s16 + $0xc0] sm:$0xff] %v482_v51  ;;  %803 = vst [vmem:[%s1485_s16 + $0xc8] sm:$0xff] %v483_v52  ;;  %v488_v63 = vmul.f32 %v168_v60, %v168_v60  ;;  %v489_v0 = vmul.f32 %v169_v61, %v169_v61  ;;  %v171_v2 = vld [vmem:[%s1470_s29 + $0x108] sm:$0xff] }
  0x48   : > { %804 = vst [vmem:[%s1485_s16 + $0xd0] sm:$0xff] %v484_v53  ;;  %v490_v1 = vmul.f32 %v170_v62, %v170_v62  ;;  %v172_v3 = vld [vmem:[%s1470_s29 + $0x110] sm:$0xff]  ;;  %v173_v4 = vld [vmem:[%s1470_s29 + $0x118] sm:$0xff]  ;;  %805 = vst [vmem:[%s1485_s16 + $0xd8] sm:$0xff] %v485_v57  ;;  %v491_v5 = vmul.f32 %v171_v2, %v171_v2 }
  0x49   : > { %806 = vst [vmem:[%s1485_s16 + $0xe0] sm:$0xff] %v486_v58  ;;  %807 = vst [vmem:[%s1485_s16 + $0xe8] sm:$0xff] %v487_v59  ;;  %v492_v6 = vmul.f32 %v172_v3, %v172_v3  ;;  %v493_v7 = vmul.f32 %v173_v4, %v173_v4  ;;  %v174_v8 = vld [vmem:[%s1470_s29 + $0x120] sm:$0xff]  ;;  %v175_v9 = vld [vmem:[%s1470_s29 + $0x128] sm:$0xff] }
  0x4a   : > { %v176_v10 = vld [vmem:[%s1470_s29 + $0x130] sm:$0xff]  ;;  %808 = vst [vmem:[%s1485_s16 + $0xf0] sm:$0xff] %v488_v63  ;;  %809 = vst [vmem:[%s1485_s16 + $0xf8] sm:$0xff] %v489_v0  ;;  %v494_v11 = vmul.f32 %v174_v8, %v174_v8  ;;  %v495_v12 = vmul.f32 %v175_v9, %v175_v9  ;;  %v177_v14 = vld [vmem:[%s1470_s29 + $0x138] sm:$0xff] }
  0x4b   : > { %810 = vst [vmem:[%s1485_s16 + $0x100] sm:$0xff] %v490_v1  ;;  %v496_v13 = vmul.f32 %v176_v10, %v176_v10  ;;  %v178_v15 = vld [vmem:[%s1470_s29 + $0x140] sm:$0xff]  ;;  %v179_v16 = vld [vmem:[%s1470_s29 + $0x148] sm:$0xff]  ;;  %811 = vst [vmem:[%s1485_s16 + $0x108] sm:$0xff] %v491_v5  ;;  %v497_v17 = vmul.f32 %v177_v14, %v177_v14 }
  0x4c   : > { %812 = vst [vmem:[%s1485_s16 + $0x110] sm:$0xff] %v492_v6  ;;  %813 = vst [vmem:[%s1485_s16 + $0x118] sm:$0xff] %v493_v7  ;;  %v498_v18 = vmul.f32 %v178_v15, %v178_v15  ;;  %v499_v19 = vmul.f32 %v179_v16, %v179_v16  ;;  %v180_v20 = vld [vmem:[%s1470_s29 + $0x150] sm:$0xff]  ;;  %v181_v21 = vld [vmem:[%s1470_s29 + $0x158] sm:$0xff] }
  0x4d   : > { %v182_v22 = vld [vmem:[%s1470_s29 + $0x160] sm:$0xff]  ;;  %814 = vst [vmem:[%s1485_s16 + $0x120] sm:$0xff] %v494_v11  ;;  %815 = vst [vmem:[%s1485_s16 + $0x128] sm:$0xff] %v495_v12  ;;  %v500_v23 = vmul.f32 %v180_v20, %v180_v20  ;;  %v501_v24 = vmul.f32 %v181_v21, %v181_v21  ;;  %v183_v26 = vld [vmem:[%s1470_s29 + $0x168] sm:$0xff] }
  0x4e   : > { %816 = vst [vmem:[%s1485_s16 + $0x130] sm:$0xff] %v496_v13  ;;  %v502_v25 = vmul.f32 %v182_v22, %v182_v22  ;;  %v184_v27 = vld [vmem:[%s1470_s29 + $0x170] sm:$0xff]  ;;  %v185_v28 = vld [vmem:[%s1470_s29 + $0x178] sm:$0xff]  ;;  %817 = vst [vmem:[%s1485_s16 + $0x138] sm:$0xff] %v497_v17  ;;  %v503_v29 = vmul.f32 %v183_v26, %v183_v26 }
  0x4f   : > { %818 = vst [vmem:[%s1485_s16 + $0x140] sm:$0xff] %v498_v18  ;;  %819 = vst [vmem:[%s1485_s16 + $0x148] sm:$0xff] %v499_v19  ;;  %v504_v30 = vmul.f32 %v184_v27, %v184_v27  ;;  %v505_v31 = vmul.f32 %v185_v28, %v185_v28  ;;  %v186_v32 = vld [vmem:[%s1470_s29 + $0x180] sm:$0xff]  ;;  %v187_v33 = vld [vmem:[%s1470_s29 + $0x188] sm:$0xff] }
  0x50   : > { %v188_v34 = vld [vmem:[%s1470_s29 + $0x190] sm:$0xff]  ;;  %820 = vst [vmem:[%s1485_s16 + $0x150] sm:$0xff] %v500_v23  ;;  %821 = vst [vmem:[%s1485_s16 + $0x158] sm:$0xff] %v501_v24  ;;  %v506_v35 = vmul.f32 %v186_v32, %v186_v32  ;;  %v507_v36 = vmul.f32 %v187_v33, %v187_v33  ;;  %v189_v38 = vld [vmem:[%s1470_s29 + $0x198] sm:$0xff] }
  0x51   : > { %822 = vst [vmem:[%s1485_s16 + $0x160] sm:$0xff] %v502_v25  ;;  %v508_v37 = vmul.f32 %v188_v34, %v188_v34  ;;  %v190_v39 = vld [vmem:[%s1470_s29 + $0x1a0] sm:$0xff]  ;;  %v191_v40 = vld [vmem:[%s1470_s29 + $0x1a8] sm:$0xff]  ;;  %823 = vst [vmem:[%s1485_s16 + $0x168] sm:$0xff] %v503_v29  ;;  %v509_v41 = vmul.f32 %v189_v38, %v189_v38 }
  0x52   : > { %824 = vst [vmem:[%s1485_s16 + $0x170] sm:$0xff] %v504_v30  ;;  %825 = vst [vmem:[%s1485_s16 + $0x178] sm:$0xff] %v505_v31  ;;  %v510_v42 = vmul.f32 %v190_v39, %v190_v39  ;;  %v511_v43 = vmul.f32 %v191_v40, %v191_v40  ;;  %v192_v44 = vld [vmem:[%s1470_s29 + $0x1b0] sm:$0xff]  ;;  %v193_v45 = vld [vmem:[%s1470_s29 + $0x1b8] sm:$0xff] }
  0x53   : > { %v194_v46 = vld [vmem:[%s1470_s29 + $0x1c0] sm:$0xff]  ;;  %826 = vst [vmem:[%s1485_s16 + $0x180] sm:$0xff] %v506_v35  ;;  %827 = vst [vmem:[%s1485_s16 + $0x188] sm:$0xff] %v507_v36  ;;  %v512_v47 = vmul.f32 %v192_v44, %v192_v44  ;;  %v513_v48 = vmul.f32 %v193_v45, %v193_v45  ;;  %v195_v50 = vld [vmem:[%s1470_s29 + $0x1c8] sm:$0xff] }
  0x54   : > { %828 = vst [vmem:[%s1485_s16 + $0x190] sm:$0xff] %v508_v37  ;;  %v514_v49 = vmul.f32 %v194_v46, %v194_v46  ;;  %v196_v51 = vld [vmem:[%s1470_s29 + $0x1d0] sm:$0xff]  ;;  %v197_v52 = vld [vmem:[%s1470_s29 + $0x1d8] sm:$0xff]  ;;  %829 = vst [vmem:[%s1485_s16 + $0x198] sm:$0xff] %v509_v41  ;;  %v515_v53 = vmul.f32 %v195_v50, %v195_v50 }
  0x55   : > { %830 = vst [vmem:[%s1485_s16 + $0x1a0] sm:$0xff] %v510_v42  ;;  %831 = vst [vmem:[%s1485_s16 + $0x1a8] sm:$0xff] %v511_v43  ;;  %v516_v54 = vmul.f32 %v196_v51, %v196_v51  ;;  %v517_v55 = vmul.f32 %v197_v52, %v197_v52  ;;  %v198_v56 = vld [vmem:[%s1470_s29 + $0x1e0] sm:$0xff]  ;;  %v199_v57 = vld [vmem:[%s1470_s29 + $0x1e8] sm:$0xff] }
  0x56   : > { %v200_v58 = vld [vmem:[%s1470_s29 + $0x1f0] sm:$0xff]  ;;  %832 = vst [vmem:[%s1485_s16 + $0x1b0] sm:$0xff] %v512_v47  ;;  %833 = vst [vmem:[%s1485_s16 + $0x1b8] sm:$0xff] %v513_v48  ;;  %v518_v59 = vmul.f32 %v198_v56, %v198_v56  ;;  %v519_v60 = vmul.f32 %v199_v57, %v199_v57  ;;  %v201_v62 = vld [vmem:[%s1470_s29 + $0x1f8] sm:$0xff] }
  0x57   : > { %834 = vst [vmem:[%s1485_s16 + $0x1c0] sm:$0xff] %v514_v49  ;;  %v520_v61 = vmul.f32 %v200_v58, %v200_v58  ;;  %v202_v63 = vld [vmem:[%s1470_s29 + $0x200] sm:$0xff]  ;;  %v203_v0 = vld [vmem:[%s1470_s29 + $0x208] sm:$0xff]  ;;  %835 = vst [vmem:[%s1485_s16 + $0x1c8] sm:$0xff] %v515_v53  ;;  %v521_v1 = vmul.f32 %v201_v62, %v201_v62 }
  0x58   : > { %836 = vst [vmem:[%s1485_s16 + $0x1d0] sm:$0xff] %v516_v54  ;;  %837 = vst [vmem:[%s1485_s16 + $0x1d8] sm:$0xff] %v517_v55  ;;  %v522_v2 = vmul.f32 %v202_v63, %v202_v63  ;;  %v523_v3 = vmul.f32 %v203_v0, %v203_v0  ;;  %v204_v4 = vld [vmem:[%s1470_s29 + $0x210] sm:$0xff]  ;;  %v205_v5 = vld [vmem:[%s1470_s29 + $0x218] sm:$0xff] }
  0x59   : > { %v206_v6 = vld [vmem:[%s1470_s29 + $0x220] sm:$0xff]  ;;  %838 = vst [vmem:[%s1485_s16 + $0x1e0] sm:$0xff] %v518_v59  ;;  %839 = vst [vmem:[%s1485_s16 + $0x1e8] sm:$0xff] %v519_v60  ;;  %v524_v7 = vmul.f32 %v204_v4, %v204_v4  ;;  %v525_v8 = vmul.f32 %v205_v5, %v205_v5  ;;  %v207_v10 = vld [vmem:[%s1470_s29 + $0x228] sm:$0xff] }
  0x5a   : > { %840 = vst [vmem:[%s1485_s16 + $0x1f0] sm:$0xff] %v520_v61  ;;  %v526_v9 = vmul.f32 %v206_v6, %v206_v6  ;;  %v208_v11 = vld [vmem:[%s1470_s29 + $0x230] sm:$0xff]  ;;  %v209_v12 = vld [vmem:[%s1470_s29 + $0x238] sm:$0xff]  ;;  %841 = vst [vmem:[%s1485_s16 + $0x1f8] sm:$0xff] %v521_v1  ;;  %v527_v13 = vmul.f32 %v207_v10, %v207_v10 }
  0x5b   : > { %842 = vst [vmem:[%s1485_s16 + $0x200] sm:$0xff] %v522_v2  ;;  %843 = vst [vmem:[%s1485_s16 + $0x208] sm:$0xff] %v523_v3  ;;  %v528_v14 = vmul.f32 %v208_v11, %v208_v11  ;;  %v529_v15 = vmul.f32 %v209_v12, %v209_v12  ;;  %v210_v16 = vld [vmem:[%s1470_s29 + $0x240] sm:$0xff]  ;;  %v211_v17 = vld [vmem:[%s1470_s29 + $0x248] sm:$0xff] }
  0x5c   : > { %v212_v18 = vld [vmem:[%s1470_s29 + $0x250] sm:$0xff]  ;;  %844 = vst [vmem:[%s1485_s16 + $0x210] sm:$0xff] %v524_v7  ;;  %845 = vst [vmem:[%s1485_s16 + $0x218] sm:$0xff] %v525_v8  ;;  %v530_v19 = vmul.f32 %v210_v16, %v210_v16  ;;  %v531_v20 = vmul.f32 %v211_v17, %v211_v17  ;;  %v213_v22 = vld [vmem:[%s1470_s29 + $0x258] sm:$0xff] }
  0x5d   : > { %846 = vst [vmem:[%s1485_s16 + $0x220] sm:$0xff] %v526_v9  ;;  %v532_v21 = vmul.f32 %v212_v18, %v212_v18  ;;  %v214_v23 = vld [vmem:[%s1470_s29 + $0x260] sm:$0xff]  ;;  %v215_v24 = vld [vmem:[%s1470_s29 + $0x268] sm:$0xff]  ;;  %847 = vst [vmem:[%s1485_s16 + $0x228] sm:$0xff] %v527_v13  ;;  %v533_v25 = vmul.f32 %v213_v22, %v213_v22 }
  0x5e   : > { %848 = vst [vmem:[%s1485_s16 + $0x230] sm:$0xff] %v528_v14  ;;  %849 = vst [vmem:[%s1485_s16 + $0x238] sm:$0xff] %v529_v15  ;;  %v534_v26 = vmul.f32 %v214_v23, %v214_v23  ;;  %v535_v27 = vmul.f32 %v215_v24, %v215_v24  ;;  %v216_v28 = vld [vmem:[%s1470_s29 + $0x270] sm:$0xff]  ;;  %v217_v29 = vld [vmem:[%s1470_s29 + $0x278] sm:$0xff] }
  0x5f   : > { %v218_v30 = vld [vmem:[%s1470_s29 + $0x280] sm:$0xff]  ;;  %850 = vst [vmem:[%s1485_s16 + $0x240] sm:$0xff] %v530_v19  ;;  %851 = vst [vmem:[%s1485_s16 + $0x248] sm:$0xff] %v531_v20  ;;  %v536_v31 = vmul.f32 %v216_v28, %v216_v28  ;;  %v537_v32 = vmul.f32 %v217_v29, %v217_v29  ;;  %v219_v34 = vld [vmem:[%s1470_s29 + $0x288] sm:$0xff] }
  0x60   : > { %852 = vst [vmem:[%s1485_s16 + $0x250] sm:$0xff] %v532_v21  ;;  %v538_v33 = vmul.f32 %v218_v30, %v218_v30  ;;  %v220_v35 = vld [vmem:[%s1470_s29 + $0x290] sm:$0xff]  ;;  %v221_v36 = vld [vmem:[%s1470_s29 + $0x298] sm:$0xff]  ;;  %853 = vst [vmem:[%s1485_s16 + $0x258] sm:$0xff] %v533_v25  ;;  %v539_v37 = vmul.f32 %v219_v34, %v219_v34 }
  0x61   : > { %854 = vst [vmem:[%s1485_s16 + $0x260] sm:$0xff] %v534_v26  ;;  %855 = vst [vmem:[%s1485_s16 + $0x268] sm:$0xff] %v535_v27  ;;  %v540_v38 = vmul.f32 %v220_v35, %v220_v35  ;;  %v541_v39 = vmul.f32 %v221_v36, %v221_v36  ;;  %v222_v40 = vld [vmem:[%s1470_s29 + $0x2a0] sm:$0xff]  ;;  %v223_v41 = vld [vmem:[%s1470_s29 + $0x2a8] sm:$0xff] }
  0x62   : > { %v224_v42 = vld [vmem:[%s1470_s29 + $0x2b0] sm:$0xff]  ;;  %856 = vst [vmem:[%s1485_s16 + $0x270] sm:$0xff] %v536_v31  ;;  %857 = vst [vmem:[%s1485_s16 + $0x278] sm:$0xff] %v537_v32  ;;  %v542_v43 = vmul.f32 %v222_v40, %v222_v40  ;;  %v543_v44 = vmul.f32 %v223_v41, %v223_v41  ;;  %v225_v46 = vld [vmem:[%s1470_s29 + $0x2b8] sm:$0xff] }
  0x63   : > { %858 = vst [vmem:[%s1485_s16 + $0x280] sm:$0xff] %v538_v33  ;;  %v544_v45 = vmul.f32 %v224_v42, %v224_v42  ;;  %v226_v47 = vld [vmem:[%s1470_s29 + $0x2c0] sm:$0xff]  ;;  %v227_v48 = vld [vmem:[%s1470_s29 + $0x2c8] sm:$0xff]  ;;  %859 = vst [vmem:[%s1485_s16 + $0x288] sm:$0xff] %v539_v37  ;;  %v545_v49 = vmul.f32 %v225_v46, %v225_v46 }
  0x64   : > { %860 = vst [vmem:[%s1485_s16 + $0x290] sm:$0xff] %v540_v38  ;;  %861 = vst [vmem:[%s1485_s16 + $0x298] sm:$0xff] %v541_v39  ;;  %v546_v50 = vmul.f32 %v226_v47, %v226_v47  ;;  %v547_v51 = vmul.f32 %v227_v48, %v227_v48  ;;  %v228_v52 = vld [vmem:[%s1470_s29 + $0x2d0] sm:$0xff]  ;;  %v229_v53 = vld [vmem:[%s1470_s29 + $0x2d8] sm:$0xff] }
  0x65   : > { %v230_v54 = vld [vmem:[%s1470_s29 + $0x2e0] sm:$0xff]  ;;  %862 = vst [vmem:[%s1485_s16 + $0x2a0] sm:$0xff] %v542_v43  ;;  %863 = vst [vmem:[%s1485_s16 + $0x2a8] sm:$0xff] %v543_v44  ;;  %v548_v55 = vmul.f32 %v228_v52, %v228_v52  ;;  %v549_v56 = vmul.f32 %v229_v53, %v229_v53  ;;  %v231_v58 = vld [vmem:[%s1470_s29 + $0x2e8] sm:$0xff] }
  0x66   : > { %864 = vst [vmem:[%s1485_s16 + $0x2b0] sm:$0xff] %v544_v45  ;;  %v550_v57 = vmul.f32 %v230_v54, %v230_v54  ;;  %v232_v59 = vld [vmem:[%s1470_s29 + $0x2f0] sm:$0xff]  ;;  %v233_v60 = vld [vmem:[%s1470_s29 + $0x2f8] sm:$0xff]  ;;  %865 = vst [vmem:[%s1485_s16 + $0x2b8] sm:$0xff] %v545_v49  ;;  %v551_v61 = vmul.f32 %v231_v58, %v231_v58 }
  0x67   : > { %866 = vst [vmem:[%s1485_s16 + $0x2c0] sm:$0xff] %v546_v50  ;;  %867 = vst [vmem:[%s1485_s16 + $0x2c8] sm:$0xff] %v547_v51  ;;  %v552_v62 = vmul.f32 %v232_v59, %v232_v59  ;;  %v553_v63 = vmul.f32 %v233_v60, %v233_v60  ;;  %v234_v0 = vld [vmem:[%s1470_s29 + $0x300] sm:$0xff]  ;;  %v235_v1 = vld [vmem:[%s1470_s29 + $0x308] sm:$0xff] }
  0x68   : > { %v236_v2 = vld [vmem:[%s1470_s29 + $0x310] sm:$0xff]  ;;  %868 = vst [vmem:[%s1485_s16 + $0x2d0] sm:$0xff] %v548_v55  ;;  %869 = vst [vmem:[%s1485_s16 + $0x2d8] sm:$0xff] %v549_v56  ;;  %v554_v3 = vmul.f32 %v234_v0, %v234_v0  ;;  %v555_v4 = vmul.f32 %v235_v1, %v235_v1  ;;  %v237_v6 = vld [vmem:[%s1470_s29 + $0x318] sm:$0xff] }
  0x69   : > { %870 = vst [vmem:[%s1485_s16 + $0x2e0] sm:$0xff] %v550_v57  ;;  %v556_v5 = vmul.f32 %v236_v2, %v236_v2  ;;  %v238_v7 = vld [vmem:[%s1470_s29 + $0x320] sm:$0xff]  ;;  %v239_v8 = vld [vmem:[%s1470_s29 + $0x328] sm:$0xff]  ;;  %871 = vst [vmem:[%s1485_s16 + $0x2e8] sm:$0xff] %v551_v61  ;;  %v557_v9 = vmul.f32 %v237_v6, %v237_v6 }
  0x6a   : > { %872 = vst [vmem:[%s1485_s16 + $0x2f0] sm:$0xff] %v552_v62  ;;  %873 = vst [vmem:[%s1485_s16 + $0x2f8] sm:$0xff] %v553_v63  ;;  %v558_v10 = vmul.f32 %v238_v7, %v238_v7  ;;  %v559_v11 = vmul.f32 %v239_v8, %v239_v8  ;;  %v240_v12 = vld [vmem:[%s1470_s29 + $0x330] sm:$0xff]  ;;  %v241_v13 = vld [vmem:[%s1470_s29 + $0x338] sm:$0xff] }
  0x6b   : > { %v242_v14 = vld [vmem:[%s1470_s29 + $0x340] sm:$0xff]  ;;  %874 = vst [vmem:[%s1485_s16 + $0x300] sm:$0xff] %v554_v3  ;;  %875 = vst [vmem:[%s1485_s16 + $0x308] sm:$0xff] %v555_v4  ;;  %v560_v15 = vmul.f32 %v240_v12, %v240_v12  ;;  %v561_v16 = vmul.f32 %v241_v13, %v241_v13  ;;  %v243_v18 = vld [vmem:[%s1470_s29 + $0x348] sm:$0xff] }
  0x6c   : > { %876 = vst [vmem:[%s1485_s16 + $0x310] sm:$0xff] %v556_v5  ;;  %v562_v17 = vmul.f32 %v242_v14, %v242_v14  ;;  %v244_v19 = vld [vmem:[%s1470_s29 + $0x350] sm:$0xff]  ;;  %v245_v20 = vld [vmem:[%s1470_s29 + $0x358] sm:$0xff]  ;;  %877 = vst [vmem:[%s1485_s16 + $0x318] sm:$0xff] %v557_v9  ;;  %v563_v21 = vmul.f32 %v243_v18, %v243_v18 }
  0x6d   : > { %878 = vst [vmem:[%s1485_s16 + $0x320] sm:$0xff] %v558_v10  ;;  %879 = vst [vmem:[%s1485_s16 + $0x328] sm:$0xff] %v559_v11  ;;  %v564_v22 = vmul.f32 %v244_v19, %v244_v19  ;;  %v565_v23 = vmul.f32 %v245_v20, %v245_v20  ;;  %v246_v24 = vld [vmem:[%s1470_s29 + $0x360] sm:$0xff]  ;;  %v247_v25 = vld [vmem:[%s1470_s29 + $0x368] sm:$0xff] }
  0x6e   : > { %v248_v26 = vld [vmem:[%s1470_s29 + $0x370] sm:$0xff]  ;;  %880 = vst [vmem:[%s1485_s16 + $0x330] sm:$0xff] %v560_v15  ;;  %881 = vst [vmem:[%s1485_s16 + $0x338] sm:$0xff] %v561_v16  ;;  %v566_v27 = vmul.f32 %v246_v24, %v246_v24  ;;  %v567_v28 = vmul.f32 %v247_v25, %v247_v25  ;;  %v249_v30 = vld [vmem:[%s1470_s29 + $0x378] sm:$0xff] }
  0x6f   : > { %882 = vst [vmem:[%s1485_s16 + $0x340] sm:$0xff] %v562_v17  ;;  %v568_v29 = vmul.f32 %v248_v26, %v248_v26  ;;  %v250_v31 = vld [vmem:[%s1470_s29 + $0x380] sm:$0xff]  ;;  %v251_v32 = vld [vmem:[%s1470_s29 + $0x388] sm:$0xff]  ;;  %883 = vst [vmem:[%s1485_s16 + $0x348] sm:$0xff] %v563_v21  ;;  %v569_v33 = vmul.f32 %v249_v30, %v249_v30 }
  0x70   : > { %884 = vst [vmem:[%s1485_s16 + $0x350] sm:$0xff] %v564_v22  ;;  %885 = vst [vmem:[%s1485_s16 + $0x358] sm:$0xff] %v565_v23  ;;  %v570_v34 = vmul.f32 %v250_v31, %v250_v31  ;;  %v571_v35 = vmul.f32 %v251_v32, %v251_v32  ;;  %v252_v36 = vld [vmem:[%s1470_s29 + $0x390] sm:$0xff]  ;;  %v253_v37 = vld [vmem:[%s1470_s29 + $0x398] sm:$0xff] }
  0x71   : > { %v254_v38 = vld [vmem:[%s1470_s29 + $0x3a0] sm:$0xff]  ;;  %886 = vst [vmem:[%s1485_s16 + $0x360] sm:$0xff] %v566_v27  ;;  %887 = vst [vmem:[%s1485_s16 + $0x368] sm:$0xff] %v567_v28  ;;  %v572_v39 = vmul.f32 %v252_v36, %v252_v36  ;;  %v573_v40 = vmul.f32 %v253_v37, %v253_v37  ;;  %v255_v42 = vld [vmem:[%s1470_s29 + $0x3a8] sm:$0xff] }
  0x72   : > { %888 = vst [vmem:[%s1485_s16 + $0x370] sm:$0xff] %v568_v29  ;;  %v574_v41 = vmul.f32 %v254_v38, %v254_v38  ;;  %v256_v43 = vld [vmem:[%s1470_s29 + $0x3b0] sm:$0xff]  ;;  %v257_v44 = vld [vmem:[%s1470_s29 + $0x3b8] sm:$0xff]  ;;  %889 = vst [vmem:[%s1485_s16 + $0x378] sm:$0xff] %v569_v33  ;;  %v575_v45 = vmul.f32 %v255_v42, %v255_v42 }
  0x73   : > { %890 = vst [vmem:[%s1485_s16 + $0x380] sm:$0xff] %v570_v34  ;;  %891 = vst [vmem:[%s1485_s16 + $0x388] sm:$0xff] %v571_v35  ;;  %v576_v46 = vmul.f32 %v256_v43, %v256_v43  ;;  %v577_v47 = vmul.f32 %v257_v44, %v257_v44  ;;  %v258_v48 = vld [vmem:[%s1470_s29 + $0x3c0] sm:$0xff]  ;;  %v259_v49 = vld [vmem:[%s1470_s29 + $0x3c8] sm:$0xff] }
  0x74   : > { %v260_v50 = vld [vmem:[%s1470_s29 + $0x3d0] sm:$0xff]  ;;  %892 = vst [vmem:[%s1485_s16 + $0x390] sm:$0xff] %v572_v39  ;;  %893 = vst [vmem:[%s1485_s16 + $0x398] sm:$0xff] %v573_v40  ;;  %v578_v51 = vmul.f32 %v258_v48, %v258_v48  ;;  %v579_v52 = vmul.f32 %v259_v49, %v259_v49  ;;  %v261_v54 = vld [vmem:[%s1470_s29 + $0x3d8] sm:$0xff] }
  0x75   : > { %894 = vst [vmem:[%s1485_s16 + $0x3a0] sm:$0xff] %v574_v41  ;;  %v580_v53 = vmul.f32 %v260_v50, %v260_v50  ;;  %v262_v55 = vld [vmem:[%s1470_s29 + $0x3e0] sm:$0xff]  ;;  %v263_v56 = vld [vmem:[%s1470_s29 + $0x3e8] sm:$0xff]  ;;  %895 = vst [vmem:[%s1485_s16 + $0x3a8] sm:$0xff] %v575_v45  ;;  %v581_v57 = vmul.f32 %v261_v54, %v261_v54 }
  0x76   : > { %896 = vst [vmem:[%s1485_s16 + $0x3b0] sm:$0xff] %v576_v46  ;;  %897 = vst [vmem:[%s1485_s16 + $0x3b8] sm:$0xff] %v577_v47  ;;  %v582_v58 = vmul.f32 %v262_v55, %v262_v55  ;;  %v583_v59 = vmul.f32 %v263_v56, %v263_v56  ;;  %v264_v60 = vld [vmem:[%s1470_s29 + $0x3f0] sm:$0xff]  ;;  %v265_v61 = vld [vmem:[%s1470_s29 + $0x3f8] sm:$0xff] }
  0x77   : > { %v266_v62 = vld [vmem:[%s1470_s29 + $0x400] sm:$0xff]  ;;  %898 = vst [vmem:[%s1485_s16 + $0x3c0] sm:$0xff] %v578_v51  ;;  %899 = vst [vmem:[%s1485_s16 + $0x3c8] sm:$0xff] %v579_v52  ;;  %v584_v63 = vmul.f32 %v264_v60, %v264_v60  ;;  %v585_v0 = vmul.f32 %v265_v61, %v265_v61  ;;  %v267_v2 = vld [vmem:[%s1470_s29 + $0x408] sm:$0xff] }
  0x78   : > { %900 = vst [vmem:[%s1485_s16 + $0x3d0] sm:$0xff] %v580_v53  ;;  %v586_v1 = vmul.f32 %v266_v62, %v266_v62  ;;  %v268_v3 = vld [vmem:[%s1470_s29 + $0x410] sm:$0xff]  ;;  %v269_v4 = vld [vmem:[%s1470_s29 + $0x418] sm:$0xff]  ;;  %901 = vst [vmem:[%s1485_s16 + $0x3d8] sm:$0xff] %v581_v57  ;;  %v587_v5 = vmul.f32 %v267_v2, %v267_v2 }
  0x79   : > { %902 = vst [vmem:[%s1485_s16 + $0x3e0] sm:$0xff] %v582_v58  ;;  %903 = vst [vmem:[%s1485_s16 + $0x3e8] sm:$0xff] %v583_v59  ;;  %v588_v6 = vmul.f32 %v268_v3, %v268_v3  ;;  %v589_v7 = vmul.f32 %v269_v4, %v269_v4  ;;  %v270_v8 = vld [vmem:[%s1470_s29 + $0x420] sm:$0xff]  ;;  %v271_v9 = vld [vmem:[%s1470_s29 + $0x428] sm:$0xff] }
  0x7a   : > { %v272_v10 = vld [vmem:[%s1470_s29 + $0x430] sm:$0xff]  ;;  %904 = vst [vmem:[%s1485_s16 + $0x3f0] sm:$0xff] %v584_v63  ;;  %905 = vst [vmem:[%s1485_s16 + $0x3f8] sm:$0xff] %v585_v0  ;;  %v590_v11 = vmul.f32 %v270_v8, %v270_v8  ;;  %v591_v12 = vmul.f32 %v271_v9, %v271_v9  ;;  %v273_v14 = vld [vmem:[%s1470_s29 + $0x438] sm:$0xff] }
  0x7b   : > { %906 = vst [vmem:[%s1485_s16 + $0x400] sm:$0xff] %v586_v1  ;;  %v592_v13 = vmul.f32 %v272_v10, %v272_v10  ;;  %v274_v15 = vld [vmem:[%s1470_s29 + $0x440] sm:$0xff]  ;;  %v275_v16 = vld [vmem:[%s1470_s29 + $0x448] sm:$0xff]  ;;  %907 = vst [vmem:[%s1485_s16 + $0x408] sm:$0xff] %v587_v5  ;;  %v593_v17 = vmul.f32 %v273_v14, %v273_v14 }
  0x7c   : > { %908 = vst [vmem:[%s1485_s16 + $0x410] sm:$0xff] %v588_v6  ;;  %909 = vst [vmem:[%s1485_s16 + $0x418] sm:$0xff] %v589_v7  ;;  %v594_v18 = vmul.f32 %v274_v15, %v274_v15  ;;  %v595_v19 = vmul.f32 %v275_v16, %v275_v16  ;;  %v276_v20 = vld [vmem:[%s1470_s29 + $0x450] sm:$0xff]  ;;  %v277_v21 = vld [vmem:[%s1470_s29 + $0x458] sm:$0xff] }
  0x7d   : > { %v278_v22 = vld [vmem:[%s1470_s29 + $0x460] sm:$0xff]  ;;  %910 = vst [vmem:[%s1485_s16 + $0x420] sm:$0xff] %v590_v11  ;;  %911 = vst [vmem:[%s1485_s16 + $0x428] sm:$0xff] %v591_v12  ;;  %v596_v23 = vmul.f32 %v276_v20, %v276_v20  ;;  %v597_v24 = vmul.f32 %v277_v21, %v277_v21  ;;  %v279_v26 = vld [vmem:[%s1470_s29 + $0x468] sm:$0xff] }
  0x7e   : > { %912 = vst [vmem:[%s1485_s16 + $0x430] sm:$0xff] %v592_v13  ;;  %v598_v25 = vmul.f32 %v278_v22, %v278_v22  ;;  %v280_v27 = vld [vmem:[%s1470_s29 + $0x470] sm:$0xff]  ;;  %v281_v28 = vld [vmem:[%s1470_s29 + $0x478] sm:$0xff]  ;;  %913 = vst [vmem:[%s1485_s16 + $0x438] sm:$0xff] %v593_v17  ;;  %v599_v29 = vmul.f32 %v279_v26, %v279_v26 }
  0x7f   : > { %914 = vst [vmem:[%s1485_s16 + $0x440] sm:$0xff] %v594_v18  ;;  %915 = vst [vmem:[%s1485_s16 + $0x448] sm:$0xff] %v595_v19  ;;  %v600_v30 = vmul.f32 %v280_v27, %v280_v27  ;;  %v601_v31 = vmul.f32 %v281_v28, %v281_v28  ;;  %v282_v32 = vld [vmem:[%s1470_s29 + $0x480] sm:$0xff]  ;;  %v283_v33 = vld [vmem:[%s1470_s29 + $0x488] sm:$0xff] }
  0x80   : > { %v284_v34 = vld [vmem:[%s1470_s29 + $0x490] sm:$0xff]  ;;  %916 = vst [vmem:[%s1485_s16 + $0x450] sm:$0xff] %v596_v23  ;;  %917 = vst [vmem:[%s1485_s16 + $0x458] sm:$0xff] %v597_v24  ;;  %v602_v35 = vmul.f32 %v282_v32, %v282_v32  ;;  %v603_v36 = vmul.f32 %v283_v33, %v283_v33  ;;  %v285_v38 = vld [vmem:[%s1470_s29 + $0x498] sm:$0xff] }
  0x81   : > { %918 = vst [vmem:[%s1485_s16 + $0x460] sm:$0xff] %v598_v25  ;;  %v604_v37 = vmul.f32 %v284_v34, %v284_v34  ;;  %v286_v39 = vld [vmem:[%s1470_s29 + $0x4a0] sm:$0xff]  ;;  %v287_v40 = vld [vmem:[%s1470_s29 + $0x4a8] sm:$0xff]  ;;  %919 = vst [vmem:[%s1485_s16 + $0x468] sm:$0xff] %v599_v29  ;;  %v605_v41 = vmul.f32 %v285_v38, %v285_v38 }
  0x82   : > { %920 = vst [vmem:[%s1485_s16 + $0x470] sm:$0xff] %v600_v30  ;;  %921 = vst [vmem:[%s1485_s16 + $0x478] sm:$0xff] %v601_v31  ;;  %v606_v42 = vmul.f32 %v286_v39, %v286_v39  ;;  %v607_v43 = vmul.f32 %v287_v40, %v287_v40  ;;  %v288_v44 = vld [vmem:[%s1470_s29 + $0x4b0] sm:$0xff]  ;;  %v289_v45 = vld [vmem:[%s1470_s29 + $0x4b8] sm:$0xff] }
  0x83   : > { %v290_v46 = vld [vmem:[%s1470_s29 + $0x4c0] sm:$0xff]  ;;  %922 = vst [vmem:[%s1485_s16 + $0x480] sm:$0xff] %v602_v35  ;;  %923 = vst [vmem:[%s1485_s16 + $0x488] sm:$0xff] %v603_v36  ;;  %v608_v47 = vmul.f32 %v288_v44, %v288_v44  ;;  %v609_v48 = vmul.f32 %v289_v45, %v289_v45  ;;  %v291_v50 = vld [vmem:[%s1470_s29 + $0x4c8] sm:$0xff] }
  0x84   : > { %924 = vst [vmem:[%s1485_s16 + $0x490] sm:$0xff] %v604_v37  ;;  %v610_v49 = vmul.f32 %v290_v46, %v290_v46  ;;  %v292_v51 = vld [vmem:[%s1470_s29 + $0x4d0] sm:$0xff]  ;;  %v293_v52 = vld [vmem:[%s1470_s29 + $0x4d8] sm:$0xff]  ;;  %925 = vst [vmem:[%s1485_s16 + $0x498] sm:$0xff] %v605_v41  ;;  %v611_v53 = vmul.f32 %v291_v50, %v291_v50 }
  0x85   : > { %926 = vst [vmem:[%s1485_s16 + $0x4a0] sm:$0xff] %v606_v42  ;;  %927 = vst [vmem:[%s1485_s16 + $0x4a8] sm:$0xff] %v607_v43  ;;  %v612_v54 = vmul.f32 %v292_v51, %v292_v51  ;;  %v613_v55 = vmul.f32 %v293_v52, %v293_v52  ;;  %v294_v56 = vld [vmem:[%s1470_s29 + $0x4e0] sm:$0xff]  ;;  %v295_v57 = vld [vmem:[%s1470_s29 + $0x4e8] sm:$0xff] }
  0x86   : > { %v296_v58 = vld [vmem:[%s1470_s29 + $0x4f0] sm:$0xff]  ;;  %928 = vst [vmem:[%s1485_s16 + $0x4b0] sm:$0xff] %v608_v47  ;;  %929 = vst [vmem:[%s1485_s16 + $0x4b8] sm:$0xff] %v609_v48  ;;  %v614_v59 = vmul.f32 %v294_v56, %v294_v56  ;;  %v615_v60 = vmul.f32 %v295_v57, %v295_v57  ;;  %v297_v62 = vld [vmem:[%s1470_s29 + $0x4f8] sm:$0xff] }
  0x87   : > { %930 = vst [vmem:[%s1485_s16 + $0x4c0] sm:$0xff] %v610_v49  ;;  %v616_v61 = vmul.f32 %v296_v58, %v296_v58  ;;  %v298_v63 = vld [vmem:[%s1470_s29 + $0x500] sm:$0xff]  ;;  %v299_v0 = vld [vmem:[%s1470_s29 + $0x508] sm:$0xff]  ;;  %931 = vst [vmem:[%s1485_s16 + $0x4c8] sm:$0xff] %v611_v53  ;;  %v617_v1 = vmul.f32 %v297_v62, %v297_v62 }
  0x88   : > { %932 = vst [vmem:[%s1485_s16 + $0x4d0] sm:$0xff] %v612_v54  ;;  %933 = vst [vmem:[%s1485_s16 + $0x4d8] sm:$0xff] %v613_v55  ;;  %v618_v2 = vmul.f32 %v298_v63, %v298_v63  ;;  %v619_v3 = vmul.f32 %v299_v0, %v299_v0  ;;  %v300_v4 = vld [vmem:[%s1470_s29 + $0x510] sm:$0xff]  ;;  %v301_v5 = vld [vmem:[%s1470_s29 + $0x518] sm:$0xff] }
  0x89   : > { %v302_v6 = vld [vmem:[%s1470_s29 + $0x520] sm:$0xff]  ;;  %934 = vst [vmem:[%s1485_s16 + $0x4e0] sm:$0xff] %v614_v59  ;;  %935 = vst [vmem:[%s1485_s16 + $0x4e8] sm:$0xff] %v615_v60  ;;  %v620_v7 = vmul.f32 %v300_v4, %v300_v4  ;;  %v621_v8 = vmul.f32 %v301_v5, %v301_v5  ;;  %v303_v10 = vld [vmem:[%s1470_s29 + $0x528] sm:$0xff] }
  0x8a   : > { %936 = vst [vmem:[%s1485_s16 + $0x4f0] sm:$0xff] %v616_v61  ;;  %v622_v9 = vmul.f32 %v302_v6, %v302_v6  ;;  %v304_v11 = vld [vmem:[%s1470_s29 + $0x530] sm:$0xff]  ;;  %v305_v12 = vld [vmem:[%s1470_s29 + $0x538] sm:$0xff]  ;;  %937 = vst [vmem:[%s1485_s16 + $0x4f8] sm:$0xff] %v617_v1  ;;  %v623_v13 = vmul.f32 %v303_v10, %v303_v10 }
  0x8b   : > { %938 = vst [vmem:[%s1485_s16 + $0x500] sm:$0xff] %v618_v2  ;;  %939 = vst [vmem:[%s1485_s16 + $0x508] sm:$0xff] %v619_v3  ;;  %v624_v14 = vmul.f32 %v304_v11, %v304_v11  ;;  %v625_v15 = vmul.f32 %v305_v12, %v305_v12  ;;  %v306_v16 = vld [vmem:[%s1470_s29 + $0x540] sm:$0xff]  ;;  %v307_v17 = vld [vmem:[%s1470_s29 + $0x548] sm:$0xff] }
  0x8c   : > { %v308_v18 = vld [vmem:[%s1470_s29 + $0x550] sm:$0xff]  ;;  %940 = vst [vmem:[%s1485_s16 + $0x510] sm:$0xff] %v620_v7  ;;  %941 = vst [vmem:[%s1485_s16 + $0x518] sm:$0xff] %v621_v8  ;;  %v626_v19 = vmul.f32 %v306_v16, %v306_v16  ;;  %v627_v20 = vmul.f32 %v307_v17, %v307_v17  ;;  %v309_v22 = vld [vmem:[%s1470_s29 + $0x558] sm:$0xff] }
  0x8d   : > { %942 = vst [vmem:[%s1485_s16 + $0x520] sm:$0xff] %v622_v9  ;;  %v628_v21 = vmul.f32 %v308_v18, %v308_v18  ;;  %v310_v23 = vld [vmem:[%s1470_s29 + $0x560] sm:$0xff]  ;;  %v311_v24 = vld [vmem:[%s1470_s29 + $0x568] sm:$0xff]  ;;  %943 = vst [vmem:[%s1485_s16 + $0x528] sm:$0xff] %v623_v13  ;;  %v629_v25 = vmul.f32 %v309_v22, %v309_v22 }
  0x8e   : > { %944 = vst [vmem:[%s1485_s16 + $0x530] sm:$0xff] %v624_v14  ;;  %945 = vst [vmem:[%s1485_s16 + $0x538] sm:$0xff] %v625_v15  ;;  %v630_v26 = vmul.f32 %v310_v23, %v310_v23  ;;  %v631_v27 = vmul.f32 %v311_v24, %v311_v24  ;;  %v312_v28 = vld [vmem:[%s1470_s29 + $0x570] sm:$0xff]  ;;  %v313_v29 = vld [vmem:[%s1470_s29 + $0x578] sm:$0xff] }
  0x8f   : > { %v314_v30 = vld [vmem:[%s1470_s29 + $0x580] sm:$0xff]  ;;  %946 = vst [vmem:[%s1485_s16 + $0x540] sm:$0xff] %v626_v19  ;;  %947 = vst [vmem:[%s1485_s16 + $0x548] sm:$0xff] %v627_v20  ;;  %v632_v31 = vmul.f32 %v312_v28, %v312_v28  ;;  %v633_v32 = vmul.f32 %v313_v29, %v313_v29  ;;  %v315_v34 = vld [vmem:[%s1470_s29 + $0x588] sm:$0xff] }
  0x90   : > { %948 = vst [vmem:[%s1485_s16 + $0x550] sm:$0xff] %v628_v21  ;;  %v634_v33 = vmul.f32 %v314_v30, %v314_v30  ;;  %v316_v35 = vld [vmem:[%s1470_s29 + $0x590] sm:$0xff]  ;;  %v317_v36 = vld [vmem:[%s1470_s29 + $0x598] sm:$0xff]  ;;  %949 = vst [vmem:[%s1485_s16 + $0x558] sm:$0xff] %v629_v25  ;;  %v635_v37 = vmul.f32 %v315_v34, %v315_v34 }
  0x91   : > { %950 = vst [vmem:[%s1485_s16 + $0x560] sm:$0xff] %v630_v26  ;;  %951 = vst [vmem:[%s1485_s16 + $0x568] sm:$0xff] %v631_v27  ;;  %v636_v38 = vmul.f32 %v316_v35, %v316_v35  ;;  %v637_v39 = vmul.f32 %v317_v36, %v317_v36  ;;  %v318_v40 = vld [vmem:[%s1470_s29 + $0x5a0] sm:$0xff]  ;;  %v319_v41 = vld [vmem:[%s1470_s29 + $0x5a8] sm:$0xff] }
  0x92   : > { %v320_v42 = vld [vmem:[%s1470_s29 + $0x5b0] sm:$0xff]  ;;  %952 = vst [vmem:[%s1485_s16 + $0x570] sm:$0xff] %v632_v31  ;;  %953 = vst [vmem:[%s1485_s16 + $0x578] sm:$0xff] %v633_v32  ;;  %v638_v43 = vmul.f32 %v318_v40, %v318_v40  ;;  %v639_v44 = vmul.f32 %v319_v41, %v319_v41  ;;  %v321_v46 = vld [vmem:[%s1470_s29 + $0x5b8] sm:$0xff] }
  0x93   : > { %954 = vst [vmem:[%s1485_s16 + $0x580] sm:$0xff] %v634_v33  ;;  %v640_v45 = vmul.f32 %v320_v42, %v320_v42  ;;  %v322_v47 = vld [vmem:[%s1470_s29 + $0x5c0] sm:$0xff]  ;;  %v323_v48 = vld [vmem:[%s1470_s29 + $0x5c8] sm:$0xff]  ;;  %955 = vst [vmem:[%s1485_s16 + $0x588] sm:$0xff] %v635_v37  ;;  %v641_v49 = vmul.f32 %v321_v46, %v321_v46 }
  0x94   : > { %956 = vst [vmem:[%s1485_s16 + $0x590] sm:$0xff] %v636_v38  ;;  %957 = vst [vmem:[%s1485_s16 + $0x598] sm:$0xff] %v637_v39  ;;  %v642_v50 = vmul.f32 %v322_v47, %v322_v47  ;;  %v643_v51 = vmul.f32 %v323_v48, %v323_v48  ;;  %v324_v52 = vld [vmem:[%s1470_s29 + $0x5d0] sm:$0xff]  ;;  %v325_v53 = vld [vmem:[%s1470_s29 + $0x5d8] sm:$0xff] }
  0x95   : > { %v326_v54 = vld [vmem:[%s1470_s29 + $0x5e0] sm:$0xff]  ;;  %958 = vst [vmem:[%s1485_s16 + $0x5a0] sm:$0xff] %v638_v43  ;;  %959 = vst [vmem:[%s1485_s16 + $0x5a8] sm:$0xff] %v639_v44  ;;  %v644_v55 = vmul.f32 %v324_v52, %v324_v52  ;;  %v645_v56 = vmul.f32 %v325_v53, %v325_v53  ;;  %v327_v58 = vld [vmem:[%s1470_s29 + $0x5e8] sm:$0xff] }
  0x96   : > { %960 = vst [vmem:[%s1485_s16 + $0x5b0] sm:$0xff] %v640_v45  ;;  %v646_v57 = vmul.f32 %v326_v54, %v326_v54  ;;  %v328_v59 = vld [vmem:[%s1470_s29 + $0x5f0] sm:$0xff]  ;;  %v329_v60 = vld [vmem:[%s1470_s29 + $0x5f8] sm:$0xff]  ;;  %961 = vst [vmem:[%s1485_s16 + $0x5b8] sm:$0xff] %v641_v49  ;;  %v647_v61 = vmul.f32 %v327_v58, %v327_v58 }
  0x97   : > { %962 = vst [vmem:[%s1485_s16 + $0x5c0] sm:$0xff] %v642_v50  ;;  %963 = vst [vmem:[%s1485_s16 + $0x5c8] sm:$0xff] %v643_v51  ;;  %v648_v62 = vmul.f32 %v328_v59, %v328_v59  ;;  %v649_v63 = vmul.f32 %v329_v60, %v329_v60  ;;  %v330_v0 = vld [vmem:[%s1470_s29 + $0x600] sm:$0xff]  ;;  %v331_v1 = vld [vmem:[%s1470_s29 + $0x608] sm:$0xff] }
  0x98   : > { %v332_v2 = vld [vmem:[%s1470_s29 + $0x610] sm:$0xff]  ;;  %964 = vst [vmem:[%s1485_s16 + $0x5d0] sm:$0xff] %v644_v55  ;;  %965 = vst [vmem:[%s1485_s16 + $0x5d8] sm:$0xff] %v645_v56  ;;  %v650_v3 = vmul.f32 %v330_v0, %v330_v0  ;;  %v651_v4 = vmul.f32 %v331_v1, %v331_v1  ;;  %v333_v6 = vld [vmem:[%s1470_s29 + $0x618] sm:$0xff] }
  0x99   : > { %966 = vst [vmem:[%s1485_s16 + $0x5e0] sm:$0xff] %v646_v57  ;;  %v652_v5 = vmul.f32 %v332_v2, %v332_v2  ;;  %v334_v7 = vld [vmem:[%s1470_s29 + $0x620] sm:$0xff]  ;;  %v335_v8 = vld [vmem:[%s1470_s29 + $0x628] sm:$0xff]  ;;  %967 = vst [vmem:[%s1485_s16 + $0x5e8] sm:$0xff] %v647_v61  ;;  %v653_v9 = vmul.f32 %v333_v6, %v333_v6 }
  0x9a   : > { %968 = vst [vmem:[%s1485_s16 + $0x5f0] sm:$0xff] %v648_v62  ;;  %969 = vst [vmem:[%s1485_s16 + $0x5f8] sm:$0xff] %v649_v63  ;;  %v654_v10 = vmul.f32 %v334_v7, %v334_v7  ;;  %v655_v11 = vmul.f32 %v335_v8, %v335_v8  ;;  %v336_v12 = vld [vmem:[%s1470_s29 + $0x630] sm:$0xff]  ;;  %v337_v13 = vld [vmem:[%s1470_s29 + $0x638] sm:$0xff] }
  0x9b   : > { %v338_v14 = vld [vmem:[%s1470_s29 + $0x640] sm:$0xff]  ;;  %970 = vst [vmem:[%s1485_s16 + $0x600] sm:$0xff] %v650_v3  ;;  %971 = vst [vmem:[%s1485_s16 + $0x608] sm:$0xff] %v651_v4  ;;  %v656_v15 = vmul.f32 %v336_v12, %v336_v12  ;;  %v657_v16 = vmul.f32 %v337_v13, %v337_v13  ;;  %v339_v18 = vld [vmem:[%s1470_s29 + $0x648] sm:$0xff] }
  0x9c   : > { %972 = vst [vmem:[%s1485_s16 + $0x610] sm:$0xff] %v652_v5  ;;  %v658_v17 = vmul.f32 %v338_v14, %v338_v14  ;;  %v340_v19 = vld [vmem:[%s1470_s29 + $0x650] sm:$0xff]  ;;  %v341_v20 = vld [vmem:[%s1470_s29 + $0x658] sm:$0xff]  ;;  %973 = vst [vmem:[%s1485_s16 + $0x618] sm:$0xff] %v653_v9  ;;  %v659_v21 = vmul.f32 %v339_v18, %v339_v18 }
  0x9d   : > { %974 = vst [vmem:[%s1485_s16 + $0x620] sm:$0xff] %v654_v10  ;;  %975 = vst [vmem:[%s1485_s16 + $0x628] sm:$0xff] %v655_v11  ;;  %v660_v22 = vmul.f32 %v340_v19, %v340_v19  ;;  %v661_v23 = vmul.f32 %v341_v20, %v341_v20  ;;  %v342_v24 = vld [vmem:[%s1470_s29 + $0x660] sm:$0xff]  ;;  %v343_v25 = vld [vmem:[%s1470_s29 + $0x668] sm:$0xff] }
  0x9e   : > { %v344_v26 = vld [vmem:[%s1470_s29 + $0x670] sm:$0xff]  ;;  %976 = vst [vmem:[%s1485_s16 + $0x630] sm:$0xff] %v656_v15  ;;  %977 = vst [vmem:[%s1485_s16 + $0x638] sm:$0xff] %v657_v16  ;;  %v662_v27 = vmul.f32 %v342_v24, %v342_v24  ;;  %v663_v28 = vmul.f32 %v343_v25, %v343_v25  ;;  %v345_v30 = vld [vmem:[%s1470_s29 + $0x678] sm:$0xff] }
  0x9f   : > { %978 = vst [vmem:[%s1485_s16 + $0x640] sm:$0xff] %v658_v17  ;;  %v664_v29 = vmul.f32 %v344_v26, %v344_v26  ;;  %v346_v31 = vld [vmem:[%s1470_s29 + $0x680] sm:$0xff]  ;;  %v347_v32 = vld [vmem:[%s1470_s29 + $0x688] sm:$0xff]  ;;  %979 = vst [vmem:[%s1485_s16 + $0x648] sm:$0xff] %v659_v21  ;;  %v665_v33 = vmul.f32 %v345_v30, %v345_v30 }
  0xa0   : > { %980 = vst [vmem:[%s1485_s16 + $0x650] sm:$0xff] %v660_v22  ;;  %981 = vst [vmem:[%s1485_s16 + $0x658] sm:$0xff] %v661_v23  ;;  %v666_v34 = vmul.f32 %v346_v31, %v346_v31  ;;  %v667_v35 = vmul.f32 %v347_v32, %v347_v32  ;;  %v348_v36 = vld [vmem:[%s1470_s29 + $0x690] sm:$0xff]  ;;  %v349_v37 = vld [vmem:[%s1470_s29 + $0x698] sm:$0xff] }
  0xa1   : > { %v350_v38 = vld [vmem:[%s1470_s29 + $0x6a0] sm:$0xff]  ;;  %982 = vst [vmem:[%s1485_s16 + $0x660] sm:$0xff] %v662_v27  ;;  %983 = vst [vmem:[%s1485_s16 + $0x668] sm:$0xff] %v663_v28  ;;  %v668_v39 = vmul.f32 %v348_v36, %v348_v36  ;;  %v669_v40 = vmul.f32 %v349_v37, %v349_v37  ;;  %v351_v42 = vld [vmem:[%s1470_s29 + $0x6a8] sm:$0xff] }
  0xa2   : > { %984 = vst [vmem:[%s1485_s16 + $0x670] sm:$0xff] %v664_v29  ;;  %v670_v41 = vmul.f32 %v350_v38, %v350_v38  ;;  %v352_v43 = vld [vmem:[%s1470_s29 + $0x6b0] sm:$0xff]  ;;  %v353_v44 = vld [vmem:[%s1470_s29 + $0x6b8] sm:$0xff]  ;;  %985 = vst [vmem:[%s1485_s16 + $0x678] sm:$0xff] %v665_v33  ;;  %v671_v45 = vmul.f32 %v351_v42, %v351_v42 }
  0xa3   : > { %986 = vst [vmem:[%s1485_s16 + $0x680] sm:$0xff] %v666_v34  ;;  %987 = vst [vmem:[%s1485_s16 + $0x688] sm:$0xff] %v667_v35  ;;  %v672_v46 = vmul.f32 %v352_v43, %v352_v43  ;;  %v673_v47 = vmul.f32 %v353_v44, %v353_v44  ;;  %v354_v48 = vld [vmem:[%s1470_s29 + $0x6c0] sm:$0xff]  ;;  %v355_v49 = vld [vmem:[%s1470_s29 + $0x6c8] sm:$0xff] }
  0xa4   : > { %v356_v50 = vld [vmem:[%s1470_s29 + $0x6d0] sm:$0xff]  ;;  %988 = vst [vmem:[%s1485_s16 + $0x690] sm:$0xff] %v668_v39  ;;  %989 = vst [vmem:[%s1485_s16 + $0x698] sm:$0xff] %v669_v40  ;;  %v674_v51 = vmul.f32 %v354_v48, %v354_v48  ;;  %v675_v52 = vmul.f32 %v355_v49, %v355_v49  ;;  %v357_v54 = vld [vmem:[%s1470_s29 + $0x6d8] sm:$0xff] }
  0xa5   : > { %990 = vst [vmem:[%s1485_s16 + $0x6a0] sm:$0xff] %v670_v41  ;;  %v676_v53 = vmul.f32 %v356_v50, %v356_v50  ;;  %v358_v55 = vld [vmem:[%s1470_s29 + $0x6e0] sm:$0xff]  ;;  %v359_v56 = vld [vmem:[%s1470_s29 + $0x6e8] sm:$0xff]  ;;  %991 = vst [vmem:[%s1485_s16 + $0x6a8] sm:$0xff] %v671_v45  ;;  %v677_v57 = vmul.f32 %v357_v54, %v357_v54 }
  0xa6   : > { %992 = vst [vmem:[%s1485_s16 + $0x6b0] sm:$0xff] %v672_v46  ;;  %993 = vst [vmem:[%s1485_s16 + $0x6b8] sm:$0xff] %v673_v47  ;;  %v678_v58 = vmul.f32 %v358_v55, %v358_v55  ;;  %v679_v59 = vmul.f32 %v359_v56, %v359_v56  ;;  %v360_v60 = vld [vmem:[%s1470_s29 + $0x6f0] sm:$0xff]  ;;  %v361_v61 = vld [vmem:[%s1470_s29 + $0x6f8] sm:$0xff] }
  0xa7   : > { %v362_v62 = vld [vmem:[%s1470_s29 + $0x700] sm:$0xff]  ;;  %994 = vst [vmem:[%s1485_s16 + $0x6c0] sm:$0xff] %v674_v51  ;;  %995 = vst [vmem:[%s1485_s16 + $0x6c8] sm:$0xff] %v675_v52  ;;  %v680_v63 = vmul.f32 %v360_v60, %v360_v60  ;;  %v681_v0 = vmul.f32 %v361_v61, %v361_v61  ;;  %v363_v2 = vld [vmem:[%s1470_s29 + $0x708] sm:$0xff] }
  0xa8   : > { %996 = vst [vmem:[%s1485_s16 + $0x6d0] sm:$0xff] %v676_v53  ;;  %v682_v1 = vmul.f32 %v362_v62, %v362_v62  ;;  %v364_v3 = vld [vmem:[%s1470_s29 + $0x710] sm:$0xff]  ;;  %v365_v4 = vld [vmem:[%s1470_s29 + $0x718] sm:$0xff]  ;;  %997 = vst [vmem:[%s1485_s16 + $0x6d8] sm:$0xff] %v677_v57  ;;  %v683_v5 = vmul.f32 %v363_v2, %v363_v2 }
  0xa9   : > { %998 = vst [vmem:[%s1485_s16 + $0x6e0] sm:$0xff] %v678_v58  ;;  %999 = vst [vmem:[%s1485_s16 + $0x6e8] sm:$0xff] %v679_v59  ;;  %v684_v6 = vmul.f32 %v364_v3, %v364_v3  ;;  %v685_v7 = vmul.f32 %v365_v4, %v365_v4  ;;  %v366_v8 = vld [vmem:[%s1470_s29 + $0x720] sm:$0xff]  ;;  %v367_v9 = vld [vmem:[%s1470_s29 + $0x728] sm:$0xff] }
  0xaa   : > { %v368_v10 = vld [vmem:[%s1470_s29 + $0x730] sm:$0xff]  ;;  %1000 = vst [vmem:[%s1485_s16 + $0x6f0] sm:$0xff] %v680_v63  ;;  %1001 = vst [vmem:[%s1485_s16 + $0x6f8] sm:$0xff] %v681_v0  ;;  %v686_v11 = vmul.f32 %v366_v8, %v366_v8  ;;  %v687_v12 = vmul.f32 %v367_v9, %v367_v9  ;;  %v369_v14 = vld [vmem:[%s1470_s29 + $0x738] sm:$0xff] }
  0xab   : > { %1002 = vst [vmem:[%s1485_s16 + $0x700] sm:$0xff] %v682_v1  ;;  %v688_v13 = vmul.f32 %v368_v10, %v368_v10  ;;  %v370_v15 = vld [vmem:[%s1470_s29 + $0x740] sm:$0xff]  ;;  %v371_v16 = vld [vmem:[%s1470_s29 + $0x748] sm:$0xff]  ;;  %1003 = vst [vmem:[%s1485_s16 + $0x708] sm:$0xff] %v683_v5  ;;  %v689_v17 = vmul.f32 %v369_v14, %v369_v14 }
  0xac   : > { %1004 = vst [vmem:[%s1485_s16 + $0x710] sm:$0xff] %v684_v6  ;;  %1005 = vst [vmem:[%s1485_s16 + $0x718] sm:$0xff] %v685_v7  ;;  %v690_v18 = vmul.f32 %v370_v15, %v370_v15  ;;  %v691_v19 = vmul.f32 %v371_v16, %v371_v16  ;;  %v372_v20 = vld [vmem:[%s1470_s29 + $0x750] sm:$0xff]  ;;  %v373_v21 = vld [vmem:[%s1470_s29 + $0x758] sm:$0xff] }
  0xad   : > { %v374_v22 = vld [vmem:[%s1470_s29 + $0x760] sm:$0xff]  ;;  %1006 = vst [vmem:[%s1485_s16 + $0x720] sm:$0xff] %v686_v11  ;;  %1007 = vst [vmem:[%s1485_s16 + $0x728] sm:$0xff] %v687_v12  ;;  %v692_v23 = vmul.f32 %v372_v20, %v372_v20  ;;  %v693_v24 = vmul.f32 %v373_v21, %v373_v21  ;;  %v375_v26 = vld [vmem:[%s1470_s29 + $0x768] sm:$0xff] }
  0xae   : > { %1008 = vst [vmem:[%s1485_s16 + $0x730] sm:$0xff] %v688_v13  ;;  %v694_v25 = vmul.f32 %v374_v22, %v374_v22  ;;  %v376_v27 = vld [vmem:[%s1470_s29 + $0x770] sm:$0xff]  ;;  %v377_v28 = vld [vmem:[%s1470_s29 + $0x778] sm:$0xff]  ;;  %1009 = vst [vmem:[%s1485_s16 + $0x738] sm:$0xff] %v689_v17  ;;  %v695_v29 = vmul.f32 %v375_v26, %v375_v26 }
  0xaf   : > { %1010 = vst [vmem:[%s1485_s16 + $0x740] sm:$0xff] %v690_v18  ;;  %1011 = vst [vmem:[%s1485_s16 + $0x748] sm:$0xff] %v691_v19  ;;  %v696_v30 = vmul.f32 %v376_v27, %v376_v27  ;;  %v697_v31 = vmul.f32 %v377_v28, %v377_v28  ;;  %v378_v32 = vld [vmem:[%s1470_s29 + $0x780] sm:$0xff]  ;;  %v379_v33 = vld [vmem:[%s1470_s29 + $0x788] sm:$0xff] }
  0xb0   : > { %v380_v34 = vld [vmem:[%s1470_s29 + $0x790] sm:$0xff]  ;;  %1012 = vst [vmem:[%s1485_s16 + $0x750] sm:$0xff] %v692_v23  ;;  %1013 = vst [vmem:[%s1485_s16 + $0x758] sm:$0xff] %v693_v24  ;;  %v698_v35 = vmul.f32 %v378_v32, %v378_v32  ;;  %v699_v36 = vmul.f32 %v379_v33, %v379_v33  ;;  %v381_v38 = vld [vmem:[%s1470_s29 + $0x798] sm:$0xff] }
  0xb1   : > { %1014 = vst [vmem:[%s1485_s16 + $0x760] sm:$0xff] %v694_v25  ;;  %v700_v37 = vmul.f32 %v380_v34, %v380_v34  ;;  %v382_v39 = vld [vmem:[%s1470_s29 + $0x7a0] sm:$0xff]  ;;  %v383_v40 = vld [vmem:[%s1470_s29 + $0x7a8] sm:$0xff]  ;;  %1015 = vst [vmem:[%s1485_s16 + $0x768] sm:$0xff] %v695_v29  ;;  %v701_v41 = vmul.f32 %v381_v38, %v381_v38 }
  0xb2   : > { %1016 = vst [vmem:[%s1485_s16 + $0x770] sm:$0xff] %v696_v30  ;;  %1017 = vst [vmem:[%s1485_s16 + $0x778] sm:$0xff] %v697_v31  ;;  %v702_v42 = vmul.f32 %v382_v39, %v382_v39  ;;  %v703_v43 = vmul.f32 %v383_v40, %v383_v40  ;;  %v384_v44 = vld [vmem:[%s1470_s29 + $0x7b0] sm:$0xff]  ;;  %v385_v45 = vld [vmem:[%s1470_s29 + $0x7b8] sm:$0xff] }
  0xb3   : > { %v386_v46 = vld [vmem:[%s1470_s29 + $0x7c0] sm:$0xff]  ;;  %1018 = vst [vmem:[%s1485_s16 + $0x780] sm:$0xff] %v698_v35  ;;  %1019 = vst [vmem:[%s1485_s16 + $0x788] sm:$0xff] %v699_v36  ;;  %v704_v47 = vmul.f32 %v384_v44, %v384_v44  ;;  %v705_v48 = vmul.f32 %v385_v45, %v385_v45  ;;  %v387_v50 = vld [vmem:[%s1470_s29 + $0x7c8] sm:$0xff] }
  0xb4   : > { %1020 = vst [vmem:[%s1485_s16 + $0x790] sm:$0xff] %v700_v37  ;;  %v706_v49 = vmul.f32 %v386_v46, %v386_v46  ;;  %v388_v51 = vld [vmem:[%s1470_s29 + $0x7d0] sm:$0xff]  ;;  %v389_v52 = vld [vmem:[%s1470_s29 + $0x7d8] sm:$0xff]  ;;  %1021 = vst [vmem:[%s1485_s16 + $0x798] sm:$0xff] %v701_v41  ;;  %v707_v53 = vmul.f32 %v387_v50, %v387_v50 }
  0xb5   : > { %1022 = vst [vmem:[%s1485_s16 + $0x7a0] sm:$0xff] %v702_v42  ;;  %1023 = vst [vmem:[%s1485_s16 + $0x7a8] sm:$0xff] %v703_v43  ;;  %v708_v54 = vmul.f32 %v388_v51, %v388_v51  ;;  %v709_v55 = vmul.f32 %v389_v52, %v389_v52  ;;  %v390_v56 = vld [vmem:[%s1470_s29 + $0x7e0] sm:$0xff]  ;;  %v391_v57 = vld [vmem:[%s1470_s29 + $0x7e8] sm:$0xff] }
  0xb6   : > { %v392_v58 = vld [vmem:[%s1470_s29 + $0x7f0] sm:$0xff]  ;;  %1024 = vst [vmem:[%s1485_s16 + $0x7b0] sm:$0xff] %v704_v47  ;;  %1025 = vst [vmem:[%s1485_s16 + $0x7b8] sm:$0xff] %v705_v48  ;;  %v710_v59 = vmul.f32 %v390_v56, %v390_v56  ;;  %v711_v60 = vmul.f32 %v391_v57, %v391_v57  ;;  %v393_v62 = vld [vmem:[%s1470_s29 + $0x7f8] sm:$0xff] }
  0xb7   : > { %1026 = vst [vmem:[%s1485_s16 + $0x7c0] sm:$0xff] %v706_v49  ;;  %v712_v61 = vmul.f32 %v392_v58, %v392_v58  ;;  %v394_v63 = vld [vmem:[%s1470_s29 + $0x800] sm:$0xff]  ;;  %v395_v0 = vld [vmem:[%s1470_s29 + $0x808] sm:$0xff]  ;;  %1027 = vst [vmem:[%s1485_s16 + $0x7c8] sm:$0xff] %v707_v53  ;;  %v713_v1 = vmul.f32 %v393_v62, %v393_v62 }
  0xb8   : > { %1028 = vst [vmem:[%s1485_s16 + $0x7d0] sm:$0xff] %v708_v54  ;;  %1029 = vst [vmem:[%s1485_s16 + $0x7d8] sm:$0xff] %v709_v55  ;;  %v714_v2 = vmul.f32 %v394_v63, %v394_v63  ;;  %v715_v3 = vmul.f32 %v395_v0, %v395_v0  ;;  %v396_v4 = vld [vmem:[%s1470_s29 + $0x810] sm:$0xff]  ;;  %v397_v5 = vld [vmem:[%s1470_s29 + $0x818] sm:$0xff] }
  0xb9   : > { %v398_v6 = vld [vmem:[%s1470_s29 + $0x820] sm:$0xff]  ;;  %1030 = vst [vmem:[%s1485_s16 + $0x7e0] sm:$0xff] %v710_v59  ;;  %1031 = vst [vmem:[%s1485_s16 + $0x7e8] sm:$0xff] %v711_v60  ;;  %v716_v7 = vmul.f32 %v396_v4, %v396_v4  ;;  %v717_v8 = vmul.f32 %v397_v5, %v397_v5  ;;  %v399_v10 = vld [vmem:[%s1470_s29 + $0x828] sm:$0xff] }
  0xba   : > { %1032 = vst [vmem:[%s1485_s16 + $0x7f0] sm:$0xff] %v712_v61  ;;  %v718_v9 = vmul.f32 %v398_v6, %v398_v6  ;;  %v400_v11 = vld [vmem:[%s1470_s29 + $0x830] sm:$0xff]  ;;  %v401_v12 = vld [vmem:[%s1470_s29 + $0x838] sm:$0xff]  ;;  %1033 = vst [vmem:[%s1485_s16 + $0x7f8] sm:$0xff] %v713_v1  ;;  %v719_v13 = vmul.f32 %v399_v10, %v399_v10 }
  0xbb   : > { %1034 = vst [vmem:[%s1485_s16 + $0x800] sm:$0xff] %v714_v2  ;;  %1035 = vst [vmem:[%s1485_s16 + $0x808] sm:$0xff] %v715_v3  ;;  %v720_v14 = vmul.f32 %v400_v11, %v400_v11  ;;  %v721_v15 = vmul.f32 %v401_v12, %v401_v12  ;;  %v402_v16 = vld [vmem:[%s1470_s29 + $0x840] sm:$0xff]  ;;  %v403_v17 = vld [vmem:[%s1470_s29 + $0x848] sm:$0xff] }
  0xbc   : > { %v404_v18 = vld [vmem:[%s1470_s29 + $0x850] sm:$0xff]  ;;  %1036 = vst [vmem:[%s1485_s16 + $0x810] sm:$0xff] %v716_v7  ;;  %1037 = vst [vmem:[%s1485_s16 + $0x818] sm:$0xff] %v717_v8  ;;  %v722_v19 = vmul.f32 %v402_v16, %v402_v16  ;;  %v723_v20 = vmul.f32 %v403_v17, %v403_v17  ;;  %v405_v22 = vld [vmem:[%s1470_s29 + $0x858] sm:$0xff] }
  0xbd   : > { %1038 = vst [vmem:[%s1485_s16 + $0x820] sm:$0xff] %v718_v9  ;;  %v724_v21 = vmul.f32 %v404_v18, %v404_v18  ;;  %v406_v23 = vld [vmem:[%s1470_s29 + $0x860] sm:$0xff]  ;;  %v407_v24 = vld [vmem:[%s1470_s29 + $0x868] sm:$0xff]  ;;  %1039 = vst [vmem:[%s1485_s16 + $0x828] sm:$0xff] %v719_v13  ;;  %v725_v25 = vmul.f32 %v405_v22, %v405_v22 }
  0xbe   : > { %1040 = vst [vmem:[%s1485_s16 + $0x830] sm:$0xff] %v720_v14  ;;  %1041 = vst [vmem:[%s1485_s16 + $0x838] sm:$0xff] %v721_v15  ;;  %v726_v26 = vmul.f32 %v406_v23, %v406_v23  ;;  %v727_v27 = vmul.f32 %v407_v24, %v407_v24  ;;  %v408_v28 = vld [vmem:[%s1470_s29 + $0x870] sm:$0xff]  ;;  %v409_v29 = vld [vmem:[%s1470_s29 + $0x878] sm:$0xff] }
  0xbf   : > { %v410_v30 = vld [vmem:[%s1470_s29 + $0x880] sm:$0xff]  ;;  %1042 = vst [vmem:[%s1485_s16 + $0x840] sm:$0xff] %v722_v19  ;;  %1043 = vst [vmem:[%s1485_s16 + $0x848] sm:$0xff] %v723_v20  ;;  %v728_v31 = vmul.f32 %v408_v28, %v408_v28  ;;  %v729_v32 = vmul.f32 %v409_v29, %v409_v29  ;;  %v411_v34 = vld [vmem:[%s1470_s29 + $0x888] sm:$0xff] }
  0xc0   : > { %1044 = vst [vmem:[%s1485_s16 + $0x850] sm:$0xff] %v724_v21  ;;  %v730_v33 = vmul.f32 %v410_v30, %v410_v30  ;;  %v412_v35 = vld [vmem:[%s1470_s29 + $0x890] sm:$0xff]  ;;  %v413_v36 = vld [vmem:[%s1470_s29 + $0x898] sm:$0xff]  ;;  %1045 = vst [vmem:[%s1485_s16 + $0x858] sm:$0xff] %v725_v25  ;;  %v731_v37 = vmul.f32 %v411_v34, %v411_v34 }
  0xc1   : > { %1046 = vst [vmem:[%s1485_s16 + $0x860] sm:$0xff] %v726_v26  ;;  %1047 = vst [vmem:[%s1485_s16 + $0x868] sm:$0xff] %v727_v27  ;;  %v732_v38 = vmul.f32 %v412_v35, %v412_v35  ;;  %v733_v39 = vmul.f32 %v413_v36, %v413_v36  ;;  %v414_v40 = vld [vmem:[%s1470_s29 + $0x8a0] sm:$0xff]  ;;  %v415_v41 = vld [vmem:[%s1470_s29 + $0x8a8] sm:$0xff] }
  0xc2   : > { %v416_v42 = vld [vmem:[%s1470_s29 + $0x8b0] sm:$0xff]  ;;  %1048 = vst [vmem:[%s1485_s16 + $0x870] sm:$0xff] %v728_v31  ;;  %1049 = vst [vmem:[%s1485_s16 + $0x878] sm:$0xff] %v729_v32  ;;  %v734_v43 = vmul.f32 %v414_v40, %v414_v40  ;;  %v735_v44 = vmul.f32 %v415_v41, %v415_v41  ;;  %v417_v46 = vld [vmem:[%s1470_s29 + $0x8b8] sm:$0xff] }
  0xc3   : > { %1050 = vst [vmem:[%s1485_s16 + $0x880] sm:$0xff] %v730_v33  ;;  %v736_v45 = vmul.f32 %v416_v42, %v416_v42  ;;  %v418_v47 = vld [vmem:[%s1470_s29 + $0x8c0] sm:$0xff]  ;;  %v419_v48 = vld [vmem:[%s1470_s29 + $0x8c8] sm:$0xff]  ;;  %1051 = vst [vmem:[%s1485_s16 + $0x888] sm:$0xff] %v731_v37  ;;  %v737_v49 = vmul.f32 %v417_v46, %v417_v46 }
  0xc4   : > { %1052 = vst [vmem:[%s1485_s16 + $0x890] sm:$0xff] %v732_v38  ;;  %1053 = vst [vmem:[%s1485_s16 + $0x898] sm:$0xff] %v733_v39  ;;  %v738_v50 = vmul.f32 %v418_v47, %v418_v47  ;;  %v739_v51 = vmul.f32 %v419_v48, %v419_v48  ;;  %v420_v52 = vld [vmem:[%s1470_s29 + $0x8d0] sm:$0xff]  ;;  %v421_v53 = vld [vmem:[%s1470_s29 + $0x8d8] sm:$0xff] }
  0xc5   : > { %v422_v54 = vld [vmem:[%s1470_s29 + $0x8e0] sm:$0xff]  ;;  %1054 = vst [vmem:[%s1485_s16 + $0x8a0] sm:$0xff] %v734_v43  ;;  %1055 = vst [vmem:[%s1485_s16 + $0x8a8] sm:$0xff] %v735_v44  ;;  %v740_v55 = vmul.f32 %v420_v52, %v420_v52  ;;  %v741_v56 = vmul.f32 %v421_v53, %v421_v53  ;;  %v423_v58 = vld [vmem:[%s1470_s29 + $0x8e8] sm:$0xff] }
  0xc6   : > { %1056 = vst [vmem:[%s1485_s16 + $0x8b0] sm:$0xff] %v736_v45  ;;  %v742_v57 = vmul.f32 %v422_v54, %v422_v54  ;;  %v424_v59 = vld [vmem:[%s1470_s29 + $0x8f0] sm:$0xff]  ;;  %v425_v60 = vld [vmem:[%s1470_s29 + $0x8f8] sm:$0xff]  ;;  %1057 = vst [vmem:[%s1485_s16 + $0x8b8] sm:$0xff] %v737_v49  ;;  %v743_v61 = vmul.f32 %v423_v58, %v423_v58 }
  0xc7   : > { %1058 = vst [vmem:[%s1485_s16 + $0x8c0] sm:$0xff] %v738_v50  ;;  %1059 = vst [vmem:[%s1485_s16 + $0x8c8] sm:$0xff] %v739_v51  ;;  %v744_v62 = vmul.f32 %v424_v59, %v424_v59  ;;  %v745_v63 = vmul.f32 %v425_v60, %v425_v60  ;;  %v426_v0 = vld [vmem:[%s1470_s29 + $0x900] sm:$0xff]  ;;  %v427_v1 = vld [vmem:[%s1470_s29 + $0x908] sm:$0xff] }
  0xc8   : > { %v428_v2 = vld [vmem:[%s1470_s29 + $0x910] sm:$0xff]  ;;  %1060 = vst [vmem:[%s1485_s16 + $0x8d0] sm:$0xff] %v740_v55  ;;  %1061 = vst [vmem:[%s1485_s16 + $0x8d8] sm:$0xff] %v741_v56  ;;  %v746_v3 = vmul.f32 %v426_v0, %v426_v0  ;;  %v747_v4 = vmul.f32 %v427_v1, %v427_v1  ;;  %v429_v6 = vld [vmem:[%s1470_s29 + $0x918] sm:$0xff] }
  0xc9   : > { %1062 = vst [vmem:[%s1485_s16 + $0x8e0] sm:$0xff] %v742_v57  ;;  %v748_v5 = vmul.f32 %v428_v2, %v428_v2  ;;  %v430_v7 = vld [vmem:[%s1470_s29 + $0x920] sm:$0xff]  ;;  %v431_v8 = vld [vmem:[%s1470_s29 + $0x928] sm:$0xff]  ;;  %1063 = vst [vmem:[%s1485_s16 + $0x8e8] sm:$0xff] %v743_v61  ;;  %v749_v9 = vmul.f32 %v429_v6, %v429_v6 }
  0xca   : > { %1064 = vst [vmem:[%s1485_s16 + $0x8f0] sm:$0xff] %v744_v62  ;;  %1065 = vst [vmem:[%s1485_s16 + $0x8f8] sm:$0xff] %v745_v63  ;;  %v750_v10 = vmul.f32 %v430_v7, %v430_v7  ;;  %v751_v11 = vmul.f32 %v431_v8, %v431_v8  ;;  %v432_v12 = vld [vmem:[%s1470_s29 + $0x930] sm:$0xff]  ;;  %v433_v13 = vld [vmem:[%s1470_s29 + $0x938] sm:$0xff] }
  0xcb   : > { %v434_v14 = vld [vmem:[%s1470_s29 + $0x940] sm:$0xff]  ;;  %1066 = vst [vmem:[%s1485_s16 + $0x900] sm:$0xff] %v746_v3  ;;  %1067 = vst [vmem:[%s1485_s16 + $0x908] sm:$0xff] %v747_v4  ;;  %v752_v15 = vmul.f32 %v432_v12, %v432_v12  ;;  %v753_v16 = vmul.f32 %v433_v13, %v433_v13  ;;  %v435_v18 = vld [vmem:[%s1470_s29 + $0x948] sm:$0xff] }
  0xcc   : > { %1068 = vst [vmem:[%s1485_s16 + $0x910] sm:$0xff] %v748_v5  ;;  %v754_v17 = vmul.f32 %v434_v14, %v434_v14  ;;  %v436_v19 = vld [vmem:[%s1470_s29 + $0x950] sm:$0xff]  ;;  %v437_v20 = vld [vmem:[%s1470_s29 + $0x958] sm:$0xff]  ;;  %1069 = vst [vmem:[%s1485_s16 + $0x918] sm:$0xff] %v749_v9  ;;  %v755_v21 = vmul.f32 %v435_v18, %v435_v18 }
  0xcd   : > { %1070 = vst [vmem:[%s1485_s16 + $0x920] sm:$0xff] %v750_v10  ;;  %1071 = vst [vmem:[%s1485_s16 + $0x928] sm:$0xff] %v751_v11  ;;  %v756_v22 = vmul.f32 %v436_v19, %v436_v19  ;;  %v757_v23 = vmul.f32 %v437_v20, %v437_v20  ;;  %v438_v24 = vld [vmem:[%s1470_s29 + $0x960] sm:$0xff]  ;;  %v439_v25 = vld [vmem:[%s1470_s29 + $0x968] sm:$0xff] }
  0xce   : > { %v440_v26 = vld [vmem:[%s1470_s29 + $0x970] sm:$0xff]  ;;  %1072 = vst [vmem:[%s1485_s16 + $0x930] sm:$0xff] %v752_v15  ;;  %1073 = vst [vmem:[%s1485_s16 + $0x938] sm:$0xff] %v753_v16  ;;  %v758_v27 = vmul.f32 %v438_v24, %v438_v24  ;;  %v759_v28 = vmul.f32 %v439_v25, %v439_v25  ;;  %v441_v30 = vld [vmem:[%s1470_s29 + $0x978] sm:$0xff] }
  0xcf   : > { %1074 = vst [vmem:[%s1485_s16 + $0x940] sm:$0xff] %v754_v17  ;;  %v760_v29 = vmul.f32 %v440_v26, %v440_v26  ;;  %v442_v31 = vld [vmem:[%s1470_s29 + $0x980] sm:$0xff]  ;;  %v443_v32 = vld [vmem:[%s1470_s29 + $0x988] sm:$0xff]  ;;  %1075 = vst [vmem:[%s1485_s16 + $0x948] sm:$0xff] %v755_v21  ;;  %v761_v33 = vmul.f32 %v441_v30, %v441_v30 }
  0xd0   : > { %1076 = vst [vmem:[%s1485_s16 + $0x950] sm:$0xff] %v756_v22  ;;  %1077 = vst [vmem:[%s1485_s16 + $0x958] sm:$0xff] %v757_v23  ;;  %v762_v34 = vmul.f32 %v442_v31, %v442_v31  ;;  %v763_v35 = vmul.f32 %v443_v32, %v443_v32  ;;  %v444_v36 = vld [vmem:[%s1470_s29 + $0x990] sm:$0xff]  ;;  %v445_v37 = vld [vmem:[%s1470_s29 + $0x998] sm:$0xff] }
  0xd1   : > { %v446_v38 = vld [vmem:[%s1470_s29 + $0x9a0] sm:$0xff]  ;;  %1078 = vst [vmem:[%s1485_s16 + $0x960] sm:$0xff] %v758_v27  ;;  %1079 = vst [vmem:[%s1485_s16 + $0x968] sm:$0xff] %v759_v28  ;;  %v764_v39 = vmul.f32 %v444_v36, %v444_v36  ;;  %v765_v40 = vmul.f32 %v445_v37, %v445_v37  ;;  %v447_v42 = vld [vmem:[%s1470_s29 + $0x9a8] sm:$0xff] }
  0xd2   : > { %1080 = vst [vmem:[%s1485_s16 + $0x970] sm:$0xff] %v760_v29  ;;  %v766_v41 = vmul.f32 %v446_v38, %v446_v38  ;;  %v448_v43 = vld [vmem:[%s1470_s29 + $0x9b0] sm:$0xff]  ;;  %v449_v44 = vld [vmem:[%s1470_s29 + $0x9b8] sm:$0xff]  ;;  %1081 = vst [vmem:[%s1485_s16 + $0x978] sm:$0xff] %v761_v33  ;;  %v767_v45 = vmul.f32 %v447_v42, %v447_v42 }
  0xd3   : > { %1082 = vst [vmem:[%s1485_s16 + $0x980] sm:$0xff] %v762_v34  ;;  %1083 = vst [vmem:[%s1485_s16 + $0x988] sm:$0xff] %v763_v35  ;;  %v768_v46 = vmul.f32 %v448_v43, %v448_v43  ;;  %v769_v47 = vmul.f32 %v449_v44, %v449_v44  ;;  %v450_v48 = vld [vmem:[%s1470_s29 + $0x9c0] sm:$0xff]  ;;  %v451_v49 = vld [vmem:[%s1470_s29 + $0x9c8] sm:$0xff] }
  0xd4   : > { %v452_v50 = vld [vmem:[%s1470_s29 + $0x9d0] sm:$0xff]  ;;  %1084 = vst [vmem:[%s1485_s16 + $0x990] sm:$0xff] %v764_v39  ;;  %1085 = vst [vmem:[%s1485_s16 + $0x998] sm:$0xff] %v765_v40  ;;  %v770_v51 = vmul.f32 %v450_v48, %v450_v48  ;;  %v771_v52 = vmul.f32 %v451_v49, %v451_v49  ;;  %v453_v54 = vld [vmem:[%s1470_s29 + $0x9d8] sm:$0xff] }
  0xd5   : > { %1086 = vst [vmem:[%s1485_s16 + $0x9a0] sm:$0xff] %v766_v41  ;;  %v772_v53 = vmul.f32 %v452_v50, %v452_v50  ;;  %v454_v55 = vld [vmem:[%s1470_s29 + $0x9e0] sm:$0xff]  ;;  %v455_v56 = vld [vmem:[%s1470_s29 + $0x9e8] sm:$0xff]  ;;  %1087 = vst [vmem:[%s1485_s16 + $0x9a8] sm:$0xff] %v767_v45  ;;  %v773_v57 = vmul.f32 %v453_v54, %v453_v54 }
  0xd6   : > { %1088 = vst [vmem:[%s1485_s16 + $0x9b0] sm:$0xff] %v768_v46  ;;  %1089 = vst [vmem:[%s1485_s16 + $0x9b8] sm:$0xff] %v769_v47  ;;  %v774_v58 = vmul.f32 %v454_v55, %v454_v55  ;;  %v775_v59 = vmul.f32 %v455_v56, %v455_v56  ;;  %v456_v60 = vld [vmem:[%s1470_s29 + $0x9f0] sm:$0xff]  ;;  %v457_v61 = vld [vmem:[%s1470_s29 + $0x9f8] sm:$0xff] }
  0xd7   : > { %1090 = vst [vmem:[%s1485_s16 + $0x9c0] sm:$0xff] %v770_v51  ;;  %1091 = vst [vmem:[%s1485_s16 + $0x9c8] sm:$0xff] %v771_v52  ;;  %v776_v62 = vmul.f32 %v456_v60, %v456_v60  ;;  %v777_v63 = vmul.f32 %v457_v61, %v457_v61 }
  0xd8   : > { %1092 = vst [vmem:[%s1485_s16 + $0x9d0] sm:$0xff] %v772_v53  ;;  %1093 = vst [vmem:[%s1485_s16 + $0x9d8] sm:$0xff] %v773_v57 }
  0xd9   : > { %1094 = vst [vmem:[%s1485_s16 + $0x9e0] sm:$0xff] %v774_v58  ;;  %1095 = vst [vmem:[%s1485_s16 + $0x9e8] sm:$0xff] %v775_v59 }
  0xda   : > { %1096 = vst [vmem:[%s1485_s16 + $0x9f0] sm:$0xff] %v776_v62  ;;  %1097 = vst [vmem:[%s1485_s16 + $0x9f8] sm:$0xff] %v777_v63 }
  0xdb   : > { %1297 = shalt.err (!%p1294_p2)
}
  0xdc   : > { %s1298_s11 = scalar_lea.hbm %s2122_s30, 40960  ;;  %s1302_s19 = scalar_lea.hbm %s2172_s1, 81920 }
  0xdd   : > { %p1299_p4 = scmp.ne.s32.totalorder %s2122_s30, %s1298_s11  ;;  %p1303_p9 = scmp.lt.u32.totalorder %s2122_s30, %s2172_s1 }
  0xde   : > { %p1304_p1 = scmp.lt.u32.totalorder %s1302_s19, %s1298_s11  ;;  %p1306_p6 = scmp.lt.u32.totalorder %s1298_s11, %s2122_s30 }
  0xdf   : > { %p1300_p5 = pnand %p1299_p4, %p2178_p11 }
  0xe0   : > { %p1305_p3 = por %p1304_p1, %p1303_p9 }
  0xe1   : > { %p1301_p7 = pneg %p1300_p5 }
  0xe2   : > { %p1307_p12 = por %p1306_p6, %p1305_p3 }
  0xe4   : > { %p1308_p13 = pnand %p1307_p12, %p1301_p7 }
  0xe6   : > { %1311 = shalt.err (!%p1308_p13)
}
  0xe7   : > { %s1356_s23 = smov 512   ;;  %s1357_s26 = smov 32  }
  0xe8   : > { %1206 = dma.vmem_to_hbm [thread:$0]  (%p2178_p11), %s2112_s25, 40960, %s2122_s30, %s1099_s2, %s1356_s23, %s1356_s23, %s1357_s26  }
  0xe9 PF: > { %s1128_s29 = sand.u32 1, %s1338_s6   ;;  %p2179_p8 = scmp.ne.s32.totalorder %s2176_s18, 0 }
  0xea   : > { %p2180_p10 = scmp.ge.s32.totalorder %s1350_s9, 2  ;;  %s1129_s16 = scalar_lea.sflag [#allocation4], %s1128_s29 }
  0xec   : > { %p1213_p0 = pnand %p2180_p10, %p2179_p8 }
  0xee   : > { %1333 = dma.done.wait (!%p1213_p0), %s1129_s16, 40960  }
  0xef   : > { %1335 = vsyncadd (!%p1213_p0), %s1129_s16, 4294926336  ;;  %p14_p2 = scmp.ge.s32.totalorder %s1393_s12, 4   ;;  %s2181_s6 = smov %s1342_s7 }
  0xf0   : > { %s2182_s7 = smov %s1346_s8  ;;  %s2183_s8 = smov %s1405_s15 }
  0xf1   : > { %s2184_s9 = smov %s1393_s12  ;;  %16 = sbr.rel (!%p14_p2) target bundleno = 5 (0x5), region = 69 }
  0xf8   :  { %1134 = vsyncpa [#allocation3], 1 }
  0xf9   :  { %1136 = vsyncpa [#allocation3 + $0x1], 1 }
  0xfa   :  { %1137 = vsyncpa [#allocation4], 1 }
  0xfb   :  { %1139 = vsyncpa [#allocation4 + $0x1], 1 }

</bundles_post_ra>
